<compile_context>
chip_gen: v6e
topology: v6e:2x2x1
jax: 0.10.0
libtpu: 0.0.40
codegen_flags: <defaults>
</compile_context>

<pallas_src>
import functools

import numpy as np

import jax
import jax.numpy as jnp
from jax import lax
from jax.experimental import pallas as pl
from jax.experimental.pallas import tpu as pltpu

D_MODEL = 32      # d_model (small synthetic size; PyTorch default is 512)
N_HEAD = 4        # n_head
SEQ = 8           # sequence length L
BATCH = 2         # batch size N
FF = 4 * D_MODEL  # feed-forward hidden size
LN_EPS = 1e-5
NEG_INF = -1e9    # additive mask value for cross-batch attention entries


def cross_kernel(x1_ref, x2_ref, mask_ref, wstack_ref, w1_ref, w2_ref,
                 vec_ref, b1_ref, out1_ref, out2_ref, *, n_head):
    """Fused CrossTransformer forward: both cross() passes, all batches, one program.

    x1_ref / x2_ref : (L*N, E) seq-first flattened input1 / input2, rows (l, n).
    mask_ref        : (2*L*N, L*N) additive block mask (0 same batch, -1e9 otherwise).
    wstack_ref      : (4, E, E) = [Wq, Wk, Wv, Wo].
    vec_ref         : (9, E)    = [bq, bk, bv, bo, g1, be1, b2, g2, be2].
    w1_ref/(b1_ref) : (E, FF)/(1, FF);  w2_ref: (FF, E).
    out1_ref/out2_ref: (L*N, E) pass-1 / pass-2 outputs, rows (l, n).
    """
    f32 = jnp.float32
    R, E = x1_ref.shape              # R = L*N
    H = n_head
    hd = E // H
    scale = 1.0 / float(hd) ** 0.5
    inv_e = 1.0 / float(E)

    x1 = x1_ref[...]
    x2 = x2_ref[...]
    dif = x2 - x1                                    # shared K/V source (in-kernel)
    x_all = jnp.concatenate([x1, x2], axis=0)        # (2R, E), rows (pass, l, n)

    wq = wstack_ref[0]
    wk = wstack_ref[1]
    wv = wstack_ref[2]
    wo = wstack_ref[3]
    vec = vec_ref[...]
    bq, bk, bv, bo = vec[0:1], vec[1:2], vec[2:3], vec[3:4]
    g1, be1 = vec[4:5], vec[5:6]
    b2 = vec[6:7]
    g2, be2 = vec[7:8], vec[8:9]

    # --- projections: K/V from dif computed ONCE, shared by both passes ---
    q = jnp.dot(x_all, wq, preferred_element_type=f32) + bq     # (2R, E)
    k = jnp.dot(dif, wk, preferred_element_type=f32) + bk       # (R, E)
    v = jnp.dot(dif, wv, preferred_element_type=f32) + bv       # (R, E)

    mask = mask_ref[...]                                         # (2R, R)
    qk_dims = (((1,), (1,)), ((), ()))                           # q @ k^T, no transpose op

    # --- multi-head attention: Wo folded into the head loop (no ctx scratch) ---
    attn = jnp.zeros((2 * R, E), f32)
    for h in range(H):
        lo = h * hd
        qh = q[:, lo:lo + hd]                                    # (2R, hd)
        kh = k[:, lo:lo + hd]                                    # (R, hd)
        vh = v[:, lo:lo + hd]
        s = lax.dot_general(qh, kh, qk_dims,
                            preferred_element_type=f32) * scale + mask   # (2R, R)
        s = s - jnp.max(s, axis=-1, keepdims=True)
        p = jnp.exp(s)                                           # masked entries -> 0
        p = p * pl.reciprocal(jnp.sum(p, axis=-1, keepdims=True), approx=True)
        ctx = jnp.dot(p, vh, preferred_element_type=f32)         # (2R, hd)
        attn = attn + jnp.dot(ctx, wo[lo:lo + hd, :],            # sublane slice of Wo
                              preferred_element_type=f32)
    attn = attn + bo

    # --- residual + LayerNorm1 (sum * 1/E, rsqrt on EUP) ---
    y = x_all + attn
    mu = jnp.sum(y, axis=-1, keepdims=True) * inv_e
    yc = y - mu
    var = jnp.sum(yc * yc, axis=-1, keepdims=True) * inv_e
    y = yc * lax.rsqrt(var + LN_EPS) * g1 + be1

    # --- feed-forward (linear1 -> ReLU -> linear2) ---
    hdn = jnp.maximum(
        jnp.dot(y, w1_ref[...], preferred_element_type=f32) + b1_ref[...], 0.0)
    ff = jnp.dot(hdn, w2_ref[...], preferred_element_type=f32) + b2

    # --- residual + LayerNorm2 ---
    z = y + ff
    mu2 = jnp.sum(z, axis=-1, keepdims=True) * inv_e
    zc = z - mu2
    var2 = jnp.sum(zc * zc, axis=-1, keepdims=True) * inv_e
    z = zc * lax.rsqrt(var2 + LN_EPS) * g2 + be2

    # rows already in (pass, l, n) order -> two dense stores, caller reshapes for free
    out1_ref[...] = z[:R].astype(out1_ref.dtype)
    out2_ref[...] = z[R:].astype(out2_ref.dtype)


def _block_mask(L, N):
    """Additive attention mask enforcing per-batch attention in (l, n) row order."""
    n_id = np.arange(L * N) % N                       # batch id of row (l, n)
    same = n_id[:, None] == n_id[None, :]
    m = np.where(same, 0.0, NEG_INF).astype(np.float32)         # (L*N, L*N)
    return jnp.asarray(np.concatenate([m, m], axis=0))          # (2*L*N, L*N)


def fused_cross_pallas(x1f, x2f, mask, packed):
    """Both cross() passes for every batch row in one pallas_call (no grid)."""
    R, E = x1f.shape
    wstack, w1, w2, vecs, b1 = packed
    vmem = pl.BlockSpec(memory_space=pltpu.MemorySpace.VMEM)
    out_sh = jax.ShapeDtypeStruct((R, E), jnp.float32)
    return pl.pallas_call(
        functools.partial(cross_kernel, n_head=N_HEAD),
        out_shape=(out_sh, out_sh),
        in_specs=[vmem] * 8,
        out_specs=(vmem, vmem),
    )(x1f, x2f, mask, wstack, w1, w2, vecs, b1)


@jax.jit
def cross_transformer_forward(input1, input2, packed):
    """input1, input2: (L, N, E) seq-first, like the PyTorch module."""
    L, N, E = input1.shape
    x1f = input1.reshape(L * N, E)        # free row-major reshape, no transpose op
    x2f = input2.reshape(L * N, E)
    mask = _block_mask(L, N)              # trace-time constant
    o1, o2 = fused_cross_pallas(x1f, x2f, mask, packed)
    return o1.reshape(L, N, E), o2.reshape(L, N, E)


# ----------------------- parameter packing (done once, outside jit) ---------
def pack_params(params):
    (wq, wk, wv, bq, bk, bv, wo, bo, g1, be1, w1, b1, w2, b2, g2, be2) = params
    wstack = jnp.stack([wq, wk, wv, wo], axis=0)                         # (4, E, E)
    vecs = jnp.concatenate([bq, bk, bv, bo, g1, be1, b2, g2, be2], axis=0)  # (9, E)
    return (wstack, w1, w2, vecs, b1)


# ----------------------- pure-JAX reference (for checking) -----------------
def cross_ref(x, kv, params):
    (wq, wk, wv, bq, bk, bv, wo, bo, g1, be1, w1, b1, w2, b2, g2, be2) = params
    L, E = x.shape
    hd = E // N_HEAD
    q = x @ wq + bq
    k = kv @ wk + bk
    v = kv @ wv + bv
    outs = []
    for h in range(N_HEAD):
        qh, kh, vh = (t[:, h * hd:(h + 1) * hd] for t in (q, k, v))
        s = (qh @ kh.T) / (hd ** 0.5)
        p = jax.nn.softmax(s, axis=-1)
        outs.append(p @ vh)
    ctx = jnp.concatenate(outs, axis=-1)
    a = ctx @ wo + bo
    y = x + a
    y = (y - y.mean(-1, keepdims=True)) * lax.rsqrt(
        y.var(-1, keepdims=True) + LN_EPS) * g1 + be1
    ff = jnp.maximum(y @ w1 + b1, 0.0) @ w2 + b2
    z = y + ff
    z = (z - z.mean(-1, keepdims=True)) * lax.rsqrt(
        z.var(-1, keepdims=True) + LN_EPS) * g2 + be2
    return z


def reference_forward(input1, input2, params):
    dif = input2 - input1
    f = jax.vmap(lambda a, b: cross_ref(a, b, params), in_axes=(1, 1), out_axes=1)
    return f(input1, dif), f(input2, dif)


# ----------------------- deterministic parameter init ----------------------
def init_params(key, E=D_MODEL, ff=FF):
    ks = jax.random.split(key, 8)
    s = 0.1
    wq = s * jax.random.normal(ks[0], (E, E), jnp.float32)
    wk = s * jax.random.normal(ks[1], (E, E), jnp.float32)
    wv = s * jax.random.normal(ks[2], (E, E), jnp.float32)
    bq = s * jax.random.normal(ks[3], (1, E), jnp.float32)
    bk = jnp.zeros((1, E), jnp.float32)
    bv = jnp.zeros((1, E), jnp.float32)
    wo = s * jax.random.normal(ks[4], (E, E), jnp.float32)
    bo = jnp.zeros((1, E), jnp.float32)
    g1 = jnp.ones((1, E), jnp.float32)
    be1 = jnp.zeros((1, E), jnp.float32)
    w1 = s * jax.random.normal(ks[5], (E, ff), jnp.float32)
    b1 = s * jax.random.normal(ks[6], (1, ff), jnp.float32)
    w2 = s * jax.random.normal(ks[7], (ff, E), jnp.float32)
    b2 = jnp.zeros((1, E), jnp.float32)
    g2 = jnp.ones((1, E), jnp.float32)
    be2 = jnp.zeros((1, E), jnp.float32)
    return (wq, wk, wv, bq, bk, bv, wo, bo, g1, be1, w1, b1, w2, b2, g2, be2)


if __name__ == "__main__":
    key = jax.random.PRNGKey(0)
    k1, k2, kp = jax.random.split(key, 3)
    # seq-first inputs, like PyTorch nn.MultiheadAttention default: (L, N, E)
    input1 = jax.random.normal(k1, (SEQ, BATCH, D_MODEL), jnp.float32)
    input2 = jax.random.normal(k2, (SEQ, BATCH, D_MODEL), jnp.float32)
    params = init_params(kp)
    packed = pack_params(params)          # packed once, reused every forward call

    out1, out2 = cross_transformer_forward(input1, input2, packed)
    out1 = jax.block_until_ready(out1)
    out2 = jax.block_until_ready(out2)

    ref1, ref2 = reference_forward(input1, input2, params)
    assert out1.shape == (SEQ, BATCH, D_MODEL) and out2.shape == (SEQ, BATCH, D_MODEL)
    # tolerance relaxed (5e-3) because the softmax denominator uses the EUP
    # approximate reciprocal (pl.reciprocal(approx=True)), per the perf review.
    assert jnp.allclose(out1, ref1, atol=5e-3, rtol=5e-3)
    assert jnp.allclose(out2, ref2, atol=5e-3, rtol=5e-3)

    print("KERNEL_OK")
</pallas_src>

<mosaic_0001>
module attributes {stable_mosaic.version = 11 : i64} {
  func.func @cross_kernel(%arg0: memref<16x32xf32, #tpu.memory_space<vmem>>, %arg1: memref<16x32xf32, #tpu.memory_space<vmem>>, %arg2: memref<32x16xf32, #tpu.memory_space<vmem>>, %arg3: memref<4x32x32xf32, #tpu.memory_space<vmem>>, %arg4: memref<32x128xf32, #tpu.memory_space<vmem>>, %arg5: memref<128x32xf32, #tpu.memory_space<vmem>>, %arg6: memref<9x32xf32, #tpu.memory_space<vmem>>, %arg7: memref<1x128xf32, #tpu.memory_space<vmem>>, %arg8: memref<16x32xf32, #tpu.memory_space<vmem>>, %arg9: memref<16x32xf32, #tpu.memory_space<vmem>>) attributes {dimension_semantics = [], scalar_prefetch = 0 : i64, scratch_operands = 0 : i64, tpu.core_type = #tpu.core_type<tc>} {
    %c0 = arith.constant 0 : index
    %c0_0 = arith.constant 0 : index
    %0 = vector.load %arg0[%c0, %c0_0] : memref<16x32xf32, #tpu.memory_space<vmem>>, vector<16x32xf32>
    %c0_1 = arith.constant 0 : index
    %c0_2 = arith.constant 0 : index
    %1 = vector.load %arg1[%c0_1, %c0_2] : memref<16x32xf32, #tpu.memory_space<vmem>>, vector<16x32xf32>
    %2 = arith.subf %1, %0 : vector<16x32xf32>
    %3 = tpu.concatenate %0, %1 in 0 : vector<16x32xf32>, vector<16x32xf32> -> vector<32x32xf32>
    %c0_3 = arith.constant 0 : index
    %c0_4 = arith.constant 0 : index
    %c0_5 = arith.constant 0 : index
    %4 = vector.load %arg3[%c0_3, %c0_4, %c0_5] : memref<4x32x32xf32, #tpu.memory_space<vmem>>, vector<1x32x32xf32>
    %5 = vector.shape_cast %4 : vector<1x32x32xf32> to vector<32x32xf32>
    %c1 = arith.constant 1 : index
    %c0_6 = arith.constant 0 : index
    %c0_7 = arith.constant 0 : index
    %6 = vector.load %arg3[%c1, %c0_6, %c0_7] : memref<4x32x32xf32, #tpu.memory_space<vmem>>, vector<1x32x32xf32>
    %7 = vector.shape_cast %6 : vector<1x32x32xf32> to vector<32x32xf32>
    %c2 = arith.constant 2 : index
    %c0_8 = arith.constant 0 : index
    %c0_9 = arith.constant 0 : index
    %8 = vector.load %arg3[%c2, %c0_8, %c0_9] : memref<4x32x32xf32, #tpu.memory_space<vmem>>, vector<1x32x32xf32>
    %9 = vector.shape_cast %8 : vector<1x32x32xf32> to vector<32x32xf32>
    %c3 = arith.constant 3 : index
    %c0_10 = arith.constant 0 : index
    %c0_11 = arith.constant 0 : index
    %10 = vector.load %arg3[%c3, %c0_10, %c0_11] : memref<4x32x32xf32, #tpu.memory_space<vmem>>, vector<1x32x32xf32>
    %11 = vector.shape_cast %10 : vector<1x32x32xf32> to vector<32x32xf32>
    %c0_12 = arith.constant 0 : index
    %c0_13 = arith.constant 0 : index
    %12 = vector.load %arg6[%c0_12, %c0_13] : memref<9x32xf32, #tpu.memory_space<vmem>>, vector<9x32xf32>
    %13 = vector.extract_strided_slice %12 {offsets = [0, 0], sizes = [1, 32], strides = [1, 1]} : vector<9x32xf32> to vector<1x32xf32>
    %14 = vector.extract_strided_slice %12 {offsets = [1, 0], sizes = [1, 32], strides = [1, 1]} : vector<9x32xf32> to vector<1x32xf32>
    %15 = vector.extract_strided_slice %12 {offsets = [2, 0], sizes = [1, 32], strides = [1, 1]} : vector<9x32xf32> to vector<1x32xf32>
    %16 = vector.extract_strided_slice %12 {offsets = [3, 0], sizes = [1, 32], strides = [1, 1]} : vector<9x32xf32> to vector<1x32xf32>
    %17 = vector.extract_strided_slice %12 {offsets = [4, 0], sizes = [1, 32], strides = [1, 1]} : vector<9x32xf32> to vector<1x32xf32>
    %18 = vector.extract_strided_slice %12 {offsets = [5, 0], sizes = [1, 32], strides = [1, 1]} : vector<9x32xf32> to vector<1x32xf32>
    %19 = vector.extract_strided_slice %12 {offsets = [6, 0], sizes = [1, 32], strides = [1, 1]} : vector<9x32xf32> to vector<1x32xf32>
    %20 = vector.extract_strided_slice %12 {offsets = [7, 0], sizes = [1, 32], strides = [1, 1]} : vector<9x32xf32> to vector<1x32xf32>
    %21 = vector.extract_strided_slice %12 {offsets = [8, 0], sizes = [1, 32], strides = [1, 1]} : vector<9x32xf32> to vector<1x32xf32>
    %cst = arith.constant dense<0.000000e+00> : vector<32x32xf32>
    %22 = tpu.matmul %3, %5, %cst {dimension_numbers = #tpu.dot_dimension_numbers<[1], [0], [0], [1], [0, 0, 1, 1], [], []>} : vector<32x32xf32>, vector<32x32xf32>, vector<32x32xf32> -> vector<32x32xf32>
    %23 = vector.broadcast %13 : vector<1x32xf32> to vector<32x32xf32>
    %24 = arith.addf %22, %23 : vector<32x32xf32>
    %cst_14 = arith.constant dense<0.000000e+00> : vector<16x32xf32>
    %25 = tpu.matmul %2, %7, %cst_14 {dimension_numbers = #tpu.dot_dimension_numbers<[1], [0], [0], [1], [0, 0, 1, 1], [], []>} : vector<16x32xf32>, vector<32x32xf32>, vector<16x32xf32> -> vector<16x32xf32>
    %26 = vector.broadcast %14 : vector<1x32xf32> to vector<16x32xf32>
    %27 = arith.addf %25, %26 : vector<16x32xf32>
    %cst_15 = arith.constant dense<0.000000e+00> : vector<16x32xf32>
    %28 = tpu.matmul %2, %9, %cst_15 {dimension_numbers = #tpu.dot_dimension_numbers<[1], [0], [0], [1], [0, 0, 1, 1], [], []>} : vector<16x32xf32>, vector<32x32xf32>, vector<16x32xf32> -> vector<16x32xf32>
    %29 = vector.broadcast %15 : vector<1x32xf32> to vector<16x32xf32>
    %30 = arith.addf %28, %29 : vector<16x32xf32>
    %c0_16 = arith.constant 0 : index
    %c0_17 = arith.constant 0 : index
    %31 = vector.load %arg2[%c0_16, %c0_17] : memref<32x16xf32, #tpu.memory_space<vmem>>, vector<32x16xf32>
    %cst_18 = arith.constant 0.000000e+00 : f32
    %32 = vector.broadcast %cst_18 : f32 to vector<32x32xf32>
    %33 = vector.extract_strided_slice %24 {offsets = [0, 0], sizes = [32, 8], strides = [1, 1]} : vector<32x32xf32> to vector<32x8xf32>
    %34 = vector.extract_strided_slice %27 {offsets = [0, 0], sizes = [16, 8], strides = [1, 1]} : vector<16x32xf32> to vector<16x8xf32>
    %35 = vector.extract_strided_slice %30 {offsets = [0, 0], sizes = [16, 8], strides = [1, 1]} : vector<16x32xf32> to vector<16x8xf32>
    %cst_19 = arith.constant dense<0.000000e+00> : vector<32x16xf32>
    %36 = tpu.matmul %33, %34, %cst_19 {dimension_numbers = #tpu.dot_dimension_numbers<[1], [1], [0], [0], [0, 0, 1, 0], [], []>} : vector<32x8xf32>, vector<16x8xf32>, vector<32x16xf32> -> vector<32x16xf32>
    %cst_20 = arith.constant 0.353553385 : f32
    %37 = vector.broadcast %cst_20 : f32 to vector<32x16xf32>
    %38 = arith.mulf %36, %37 : vector<32x16xf32>
    %39 = arith.addf %38, %31 : vector<32x16xf32>
    %cst_21 = arith.constant dense<0xFF800000> : vector<32xf32>
    %40 = vector.multi_reduction <maximumf>, %39, %cst_21 [1] : vector<32x16xf32> to vector<32xf32>
    %41 = vector.shape_cast %40 : vector<32xf32> to vector<32x1xf32>
    %42 = vector.broadcast %41 : vector<32x1xf32> to vector<32x16xf32>
    %43 = arith.subf %39, %42 : vector<32x16xf32>
    %44 = math.exp %43 : vector<32x16xf32>
    %cst_22 = arith.constant dense<0.000000e+00> : vector<32xf32>
    %45 = vector.multi_reduction <add>, %44, %cst_22 [1] : vector<32x16xf32> to vector<32xf32>
    %46 = vector.shape_cast %45 : vector<32xf32> to vector<32x1xf32>
    %47 = tpu.reciprocal %46 {approx = true} : vector<32x1xf32> -> vector<32x1xf32>
    %48 = vector.broadcast %47 : vector<32x1xf32> to vector<32x16xf32>
    %49 = arith.mulf %44, %48 : vector<32x16xf32>
    %cst_23 = arith.constant dense<0.000000e+00> : vector<32x8xf32>
    %50 = tpu.matmul %49, %35, %cst_23 {dimension_numbers = #tpu.dot_dimension_numbers<[1], [0], [0], [1], [0, 0, 1, 1], [], []>} : vector<32x16xf32>, vector<16x8xf32>, vector<32x8xf32> -> vector<32x8xf32>
    %51 = vector.extract_strided_slice %11 {offsets = [0, 0], sizes = [8, 32], strides = [1, 1]} : vector<32x32xf32> to vector<8x32xf32>
    %cst_24 = arith.constant dense<0.000000e+00> : vector<32x32xf32>
    %52 = tpu.matmul %50, %51, %cst_24 {dimension_numbers = #tpu.dot_dimension_numbers<[1], [0], [0], [1], [0, 0, 1, 1], [], []>} : vector<32x8xf32>, vector<8x32xf32>, vector<32x32xf32> -> vector<32x32xf32>
    %53 = arith.addf %32, %52 : vector<32x32xf32>
    %54 = vector.extract_strided_slice %24 {offsets = [0, 8], sizes = [32, 8], strides = [1, 1]} : vector<32x32xf32> to vector<32x8xf32>
    %55 = vector.extract_strided_slice %27 {offsets = [0, 8], sizes = [16, 8], strides = [1, 1]} : vector<16x32xf32> to vector<16x8xf32>
    %56 = vector.extract_strided_slice %30 {offsets = [0, 8], sizes = [16, 8], strides = [1, 1]} : vector<16x32xf32> to vector<16x8xf32>
    %cst_25 = arith.constant dense<0.000000e+00> : vector<32x16xf32>
    %57 = tpu.matmul %54, %55, %cst_25 {dimension_numbers = #tpu.dot_dimension_numbers<[1], [1], [0], [0], [0, 0, 1, 0], [], []>} : vector<32x8xf32>, vector<16x8xf32>, vector<32x16xf32> -> vector<32x16xf32>
    %cst_26 = arith.constant 0.353553385 : f32
    %58 = vector.broadcast %cst_26 : f32 to vector<32x16xf32>
    %59 = arith.mulf %57, %58 : vector<32x16xf32>
    %60 = arith.addf %59, %31 : vector<32x16xf32>
    %cst_27 = arith.constant dense<0xFF800000> : vector<32xf32>
    %61 = vector.multi_reduction <maximumf>, %60, %cst_27 [1] : vector<32x16xf32> to vector<32xf32>
    %62 = vector.shape_cast %61 : vector<32xf32> to vector<32x1xf32>
    %63 = vector.broadcast %62 : vector<32x1xf32> to vector<32x16xf32>
    %64 = arith.subf %60, %63 : vector<32x16xf32>
    %65 = math.exp %64 : vector<32x16xf32>
    %cst_28 = arith.constant dense<0.000000e+00> : vector<32xf32>
    %66 = vector.multi_reduction <add>, %65, %cst_28 [1] : vector<32x16xf32> to vector<32xf32>
    %67 = vector.shape_cast %66 : vector<32xf32> to vector<32x1xf32>
    %68 = tpu.reciprocal %67 {approx = true} : vector<32x1xf32> -> vector<32x1xf32>
    %69 = vector.broadcast %68 : vector<32x1xf32> to vector<32x16xf32>
    %70 = arith.mulf %65, %69 : vector<32x16xf32>
    %cst_29 = arith.constant dense<0.000000e+00> : vector<32x8xf32>
    %71 = tpu.matmul %70, %56, %cst_29 {dimension_numbers = #tpu.dot_dimension_numbers<[1], [0], [0], [1], [0, 0, 1, 1], [], []>} : vector<32x16xf32>, vector<16x8xf32>, vector<32x8xf32> -> vector<32x8xf32>
    %72 = vector.extract_strided_slice %11 {offsets = [8, 0], sizes = [8, 32], strides = [1, 1]} : vector<32x32xf32> to vector<8x32xf32>
    %cst_30 = arith.constant dense<0.000000e+00> : vector<32x32xf32>
    %73 = tpu.matmul %71, %72, %cst_30 {dimension_numbers = #tpu.dot_dimension_numbers<[1], [0], [0], [1], [0, 0, 1, 1], [], []>} : vector<32x8xf32>, vector<8x32xf32>, vector<32x32xf32> -> vector<32x32xf32>
    %74 = arith.addf %53, %73 : vector<32x32xf32>
    %75 = vector.extract_strided_slice %24 {offsets = [0, 16], sizes = [32, 8], strides = [1, 1]} : vector<32x32xf32> to vector<32x8xf32>
    %76 = vector.extract_strided_slice %27 {offsets = [0, 16], sizes = [16, 8], strides = [1, 1]} : vector<16x32xf32> to vector<16x8xf32>
    %77 = vector.extract_strided_slice %30 {offsets = [0, 16], sizes = [16, 8], strides = [1, 1]} : vector<16x32xf32> to vector<16x8xf32>
    %cst_31 = arith.constant dense<0.000000e+00> : vector<32x16xf32>
    %78 = tpu.matmul %75, %76, %cst_31 {dimension_numbers = #tpu.dot_dimension_numbers<[1], [1], [0], [0], [0, 0, 1, 0], [], []>} : vector<32x8xf32>, vector<16x8xf32>, vector<32x16xf32> -> vector<32x16xf32>
    %cst_32 = arith.constant 0.353553385 : f32
    %79 = vector.broadcast %cst_32 : f32 to vector<32x16xf32>
    %80 = arith.mulf %78, %79 : vector<32x16xf32>
    %81 = arith.addf %80, %31 : vector<32x16xf32>
    %cst_33 = arith.constant dense<0xFF800000> : vector<32xf32>
    %82 = vector.multi_reduction <maximumf>, %81, %cst_33 [1] : vector<32x16xf32> to vector<32xf32>
    %83 = vector.shape_cast %82 : vector<32xf32> to vector<32x1xf32>
    %84 = vector.broadcast %83 : vector<32x1xf32> to vector<32x16xf32>
    %85 = arith.subf %81, %84 : vector<32x16xf32>
    %86 = math.exp %85 : vector<32x16xf32>
    %cst_34 = arith.constant dense<0.000000e+00> : vector<32xf32>
    %87 = vector.multi_reduction <add>, %86, %cst_34 [1] : vector<32x16xf32> to vector<32xf32>
    %88 = vector.shape_cast %87 : vector<32xf32> to vector<32x1xf32>
    %89 = tpu.reciprocal %88 {approx = true} : vector<32x1xf32> -> vector<32x1xf32>
    %90 = vector.broadcast %89 : vector<32x1xf32> to vector<32x16xf32>
    %91 = arith.mulf %86, %90 : vector<32x16xf32>
    %cst_35 = arith.constant dense<0.000000e+00> : vector<32x8xf32>
    %92 = tpu.matmul %91, %77, %cst_35 {dimension_numbers = #tpu.dot_dimension_numbers<[1], [0], [0], [1], [0, 0, 1, 1], [], []>} : vector<32x16xf32>, vector<16x8xf32>, vector<32x8xf32> -> vector<32x8xf32>
    %93 = vector.extract_strided_slice %11 {offsets = [16, 0], sizes = [8, 32], strides = [1, 1]} : vector<32x32xf32> to vector<8x32xf32>
    %cst_36 = arith.constant dense<0.000000e+00> : vector<32x32xf32>
    %94 = tpu.matmul %92, %93, %cst_36 {dimension_numbers = #tpu.dot_dimension_numbers<[1], [0], [0], [1], [0, 0, 1, 1], [], []>} : vector<32x8xf32>, vector<8x32xf32>, vector<32x32xf32> -> vector<32x32xf32>
    %95 = arith.addf %74, %94 : vector<32x32xf32>
    %96 = vector.extract_strided_slice %24 {offsets = [0, 24], sizes = [32, 8], strides = [1, 1]} : vector<32x32xf32> to vector<32x8xf32>
    %97 = vector.extract_strided_slice %27 {offsets = [0, 24], sizes = [16, 8], strides = [1, 1]} : vector<16x32xf32> to vector<16x8xf32>
    %98 = vector.extract_strided_slice %30 {offsets = [0, 24], sizes = [16, 8], strides = [1, 1]} : vector<16x32xf32> to vector<16x8xf32>
    %cst_37 = arith.constant dense<0.000000e+00> : vector<32x16xf32>
    %99 = tpu.matmul %96, %97, %cst_37 {dimension_numbers = #tpu.dot_dimension_numbers<[1], [1], [0], [0], [0, 0, 1, 0], [], []>} : vector<32x8xf32>, vector<16x8xf32>, vector<32x16xf32> -> vector<32x16xf32>
    %cst_38 = arith.constant 0.353553385 : f32
    %100 = vector.broadcast %cst_38 : f32 to vector<32x16xf32>
    %101 = arith.mulf %99, %100 : vector<32x16xf32>
    %102 = arith.addf %101, %31 : vector<32x16xf32>
    %cst_39 = arith.constant dense<0xFF800000> : vector<32xf32>
    %103 = vector.multi_reduction <maximumf>, %102, %cst_39 [1] : vector<32x16xf32> to vector<32xf32>
    %104 = vector.shape_cast %103 : vector<32xf32> to vector<32x1xf32>
    %105 = vector.broadcast %104 : vector<32x1xf32> to vector<32x16xf32>
    %106 = arith.subf %102, %105 : vector<32x16xf32>
    %107 = math.exp %106 : vector<32x16xf32>
    %cst_40 = arith.constant dense<0.000000e+00> : vector<32xf32>
    %108 = vector.multi_reduction <add>, %107, %cst_40 [1] : vector<32x16xf32> to vector<32xf32>
    %109 = vector.shape_cast %108 : vector<32xf32> to vector<32x1xf32>
    %110 = tpu.reciprocal %109 {approx = true} : vector<32x1xf32> -> vector<32x1xf32>
    %111 = vector.broadcast %110 : vector<32x1xf32> to vector<32x16xf32>
    %112 = arith.mulf %107, %111 : vector<32x16xf32>
    %cst_41 = arith.constant dense<0.000000e+00> : vector<32x8xf32>
    %113 = tpu.matmul %112, %98, %cst_41 {dimension_numbers = #tpu.dot_dimension_numbers<[1], [0], [0], [1], [0, 0, 1, 1], [], []>} : vector<32x16xf32>, vector<16x8xf32>, vector<32x8xf32> -> vector<32x8xf32>
    %114 = vector.extract_strided_slice %11 {offsets = [24, 0], sizes = [8, 32], strides = [1, 1]} : vector<32x32xf32> to vector<8x32xf32>
    %cst_42 = arith.constant dense<0.000000e+00> : vector<32x32xf32>
    %115 = tpu.matmul %113, %114, %cst_42 {dimension_numbers = #tpu.dot_dimension_numbers<[1], [0], [0], [1], [0, 0, 1, 1], [], []>} : vector<32x8xf32>, vector<8x32xf32>, vector<32x32xf32> -> vector<32x32xf32>
    %116 = arith.addf %95, %115 : vector<32x32xf32>
    %117 = vector.broadcast %16 : vector<1x32xf32> to vector<32x32xf32>
    %118 = arith.addf %116, %117 : vector<32x32xf32>
    %119 = arith.addf %3, %118 : vector<32x32xf32>
    %cst_43 = arith.constant dense<0.000000e+00> : vector<32xf32>
    %120 = vector.multi_reduction <add>, %119, %cst_43 [1] : vector<32x32xf32> to vector<32xf32>
    %121 = vector.shape_cast %120 : vector<32xf32> to vector<32x1xf32>
    %cst_44 = arith.constant 3.125000e-02 : f32
    %122 = vector.broadcast %cst_44 : f32 to vector<32x1xf32>
    %123 = arith.mulf %121, %122 : vector<32x1xf32>
    %124 = vector.broadcast %123 : vector<32x1xf32> to vector<32x32xf32>
    %125 = arith.subf %119, %124 : vector<32x32xf32>
    %126 = arith.mulf %125, %125 : vector<32x32xf32>
    %cst_45 = arith.constant dense<0.000000e+00> : vector<32xf32>
    %127 = vector.multi_reduction <add>, %126, %cst_45 [1] : vector<32x32xf32> to vector<32xf32>
    %128 = vector.shape_cast %127 : vector<32xf32> to vector<32x1xf32>
    %cst_46 = arith.constant 3.125000e-02 : f32
    %129 = vector.broadcast %cst_46 : f32 to vector<32x1xf32>
    %130 = arith.mulf %128, %129 : vector<32x1xf32>
    %cst_47 = arith.constant 9.99999974E-6 : f32
    %131 = vector.broadcast %cst_47 : f32 to vector<32x1xf32>
    %132 = arith.addf %130, %131 : vector<32x1xf32>
    %133 = math.rsqrt %132 : vector<32x1xf32>
    %134 = vector.broadcast %133 : vector<32x1xf32> to vector<32x32xf32>
    %135 = arith.mulf %125, %134 : vector<32x32xf32>
    %136 = vector.broadcast %17 : vector<1x32xf32> to vector<32x32xf32>
    %137 = arith.mulf %135, %136 : vector<32x32xf32>
    %138 = vector.broadcast %18 : vector<1x32xf32> to vector<32x32xf32>
    %139 = arith.addf %137, %138 : vector<32x32xf32>
    %c0_48 = arith.constant 0 : index
    %c0_49 = arith.constant 0 : index
    %140 = vector.load %arg4[%c0_48, %c0_49] : memref<32x128xf32, #tpu.memory_space<vmem>>, vector<32x128xf32>
    %cst_50 = arith.constant dense<0.000000e+00> : vector<32x128xf32>
    %141 = tpu.matmul %139, %140, %cst_50 {dimension_numbers = #tpu.dot_dimension_numbers<[1], [0], [0], [1], [0, 0, 1, 1], [], []>} : vector<32x32xf32>, vector<32x128xf32>, vector<32x128xf32> -> vector<32x128xf32>
    %c0_51 = arith.constant 0 : index
    %c0_52 = arith.constant 0 : index
    %142 = vector.load %arg7[%c0_51, %c0_52] : memref<1x128xf32, #tpu.memory_space<vmem>>, vector<1x128xf32>
    %143 = vector.broadcast %142 : vector<1x128xf32> to vector<32x128xf32>
    %144 = arith.addf %141, %143 : vector<32x128xf32>
    %cst_53 = arith.constant 0.000000e+00 : f32
    %145 = vector.broadcast %cst_53 : f32 to vector<32x128xf32>
    %146 = arith.maximumf %144, %145 : vector<32x128xf32>
    %c0_54 = arith.constant 0 : index
    %c0_55 = arith.constant 0 : index
    %147 = vector.load %arg5[%c0_54, %c0_55] : memref<128x32xf32, #tpu.memory_space<vmem>>, vector<128x32xf32>
    %cst_56 = arith.constant dense<0.000000e+00> : vector<32x32xf32>
    %148 = tpu.matmul %146, %147, %cst_56 {dimension_numbers = #tpu.dot_dimension_numbers<[1], [0], [0], [1], [0, 0, 1, 1], [], []>} : vector<32x128xf32>, vector<128x32xf32>, vector<32x32xf32> -> vector<32x32xf32>
    %149 = vector.broadcast %19 : vector<1x32xf32> to vector<32x32xf32>
    %150 = arith.addf %148, %149 : vector<32x32xf32>
    %151 = arith.addf %139, %150 : vector<32x32xf32>
    %cst_57 = arith.constant dense<0.000000e+00> : vector<32xf32>
    %152 = vector.multi_reduction <add>, %151, %cst_57 [1] : vector<32x32xf32> to vector<32xf32>
    %153 = vector.shape_cast %152 : vector<32xf32> to vector<32x1xf32>
    %cst_58 = arith.constant 3.125000e-02 : f32
    %154 = vector.broadcast %cst_58 : f32 to vector<32x1xf32>
    %155 = arith.mulf %153, %154 : vector<32x1xf32>
    %156 = vector.broadcast %155 : vector<32x1xf32> to vector<32x32xf32>
    %157 = arith.subf %151, %156 : vector<32x32xf32>
    %158 = arith.mulf %157, %157 : vector<32x32xf32>
    %cst_59 = arith.constant dense<0.000000e+00> : vector<32xf32>
    %159 = vector.multi_reduction <add>, %158, %cst_59 [1] : vector<32x32xf32> to vector<32xf32>
    %160 = vector.shape_cast %159 : vector<32xf32> to vector<32x1xf32>
    %cst_60 = arith.constant 3.125000e-02 : f32
    %161 = vector.broadcast %cst_60 : f32 to vector<32x1xf32>
    %162 = arith.mulf %160, %161 : vector<32x1xf32>
    %cst_61 = arith.constant 9.99999974E-6 : f32
    %163 = vector.broadcast %cst_61 : f32 to vector<32x1xf32>
    %164 = arith.addf %162, %163 : vector<32x1xf32>
    %165 = math.rsqrt %164 : vector<32x1xf32>
    %166 = vector.broadcast %165 : vector<32x1xf32> to vector<32x32xf32>
    %167 = arith.mulf %157, %166 : vector<32x32xf32>
    %168 = vector.broadcast %20 : vector<1x32xf32> to vector<32x32xf32>
    %169 = arith.mulf %167, %168 : vector<32x32xf32>
    %170 = vector.broadcast %21 : vector<1x32xf32> to vector<32x32xf32>
    %171 = arith.addf %169, %170 : vector<32x32xf32>
    %172 = vector.extract_strided_slice %171 {offsets = [0, 0], sizes = [16, 32], strides = [1, 1]} : vector<32x32xf32> to vector<16x32xf32>
    %c0_62 = arith.constant 0 : index
    %c0_63 = arith.constant 0 : index
    %173 = vector.load %arg8[%c0_62, %c0_63] : memref<16x32xf32, #tpu.memory_space<vmem>>, vector<16x32xf32>
    tpu.vector_store %arg8[%c0_62, %c0_63], %172 {strides = array<i32>} : memref<16x32xf32, #tpu.memory_space<vmem>>, vector<16x32xf32>,
    %174 = vector.extract_strided_slice %171 {offsets = [16, 0], sizes = [16, 32], strides = [1, 1]} : vector<32x32xf32> to vector<16x32xf32>
    %c0_64 = arith.constant 0 : index
    %c0_65 = arith.constant 0 : index
    %175 = vector.load %arg9[%c0_64, %c0_65] : memref<16x32xf32, #tpu.memory_space<vmem>>, vector<16x32xf32>
    tpu.vector_store %arg9[%c0_64, %c0_65], %174 {strides = array<i32>} : memref<16x32xf32, #tpu.memory_space<vmem>>, vector<16x32xf32>,
    return
  }
}

</mosaic_0001>

<bundles_post_ra>
// kernel: cross_transformer_forward.1
= control target key start
LH: loop header
LB: loop body
LE: loop exit
PB: predicated region body
PF: predicated region fallthrough
CT: control target
= control target key end

     0   :  { %15 = vsyncpa [#allocation3], 0  ;;  %s3373_s0 = inlined_call_operand.hbm [shape: f32[16,32], index: 0, kind: input, shape index: {}]   ;;  %s3374_s1 = inlined_call_operand.hbm [shape: f32[16,32], index: 1, kind: input, shape index: {}]   ;;  %s3375_s2 = inlined_call_operand.hbm [shape: f32[32,16], index: 2, kind: input, shape index: {}]   ;;  %s3376_s3 = inlined_call_operand.vmem [shape: f32[4,32,32], index: 3, kind: input, shape index: {}]   ;;  %s3377_s4 = inlined_call_operand.vmem [shape: f32[32,128], index: 4, kind: input, shape index: {}]   ;;  %s3378_s5 = inlined_call_operand.vmem [shape: f32[128,32], index: 5, kind: input, shape index: {}]   ;;  %s3379_s6 = inlined_call_operand.hbm [shape: f32[9,32], index: 6, kind: input, shape index: {}]   ;;  %s3380_s7 = inlined_call_operand.vmem [shape: f32[1,128], index: 7, kind: input, shape index: {}]   ;;  %s3381_s8 = inlined_call_operand.hbm [shape: f32[16,32], index: 8, kind: output, shape index: {0}]   ;;  %s3382_s9 = inlined_call_operand.hbm [shape: f32[16,32], index: 9, kind: output, shape index: {1}]  }
   0x1   :  { %16 = vsyncpa [#allocation6], 0 }
   0x2   :  { %17 = vsyncpa [#allocation9], 0 }
   0x3   :  { %18 = vsyncpa [#allocation4], 0 }
   0x4   :  { %19 = vsyncpa [#allocation12], 0  ;;  %s2860_s30 = smov [#allocation5]   ;;  %s2861_s11 = smov [#allocation2]  }
   0x5   :  { %s37_s10 = sshll.u32 %s2860_s30, 4  ;;  %s25_s12 = sshll.u32 %s2861_s11, 4  ;;  %s38_s10 = int_to_ptr.vmem [resolvable:$true] %s37_s10  ;;  %s26_s12 = int_to_ptr.vmem [resolvable:$true] %s25_s12 }
   0x6   :  { %s2738_s13 = scalar_lea.vmem %s38_s10, 256  ;;  %p2743_p1 = scmp.lt.s32.totalorder %s38_s10, %s38_s10 }
   0x7   :  { %p2739_p0 = scmp.ne.s32.totalorder %s38_s10, %s2738_s13  ;;  %p2744_p2 = scmp.lt.s32.totalorder %s2738_s13, %s2738_s13 }
   0x9   :  { %p2745_p3 = por %p2744_p2, %p2743_p1 }
   0xb   :  { %p2746_p4 = pnand %p2745_p3, %p2739_p0 }
   0xd   :  { %2749 = shalt.err (!%p2746_p4)
}
   0xe   :  { %s2862_s14 = smov 128   ;;  %s2863_s15 = smov 8  }
   0xf   :  { %43 = dma.hbm_to_vmem [thread:$0]  %s3374_s1, 256, %s38_s10, [#allocation6], %s2862_s14, %s2862_s14, %s2863_s15  }
  0x10   :  { %s2758_s18 = scalar_lea.vmem %s26_s12, 256  ;;  %p2763_p6 = scmp.lt.s32.totalorder %s26_s12, %s26_s12 }
  0x11   :  { %p2759_p5 = scmp.ne.s32.totalorder %s26_s12, %s2758_s18  ;;  %p2764_p7 = scmp.lt.s32.totalorder %s2758_s18, %s2758_s18 }
  0x13   :  { %p2765_p8 = por %p2764_p7, %p2763_p6 }
  0x15   :  { %p2766_p9 = pnand %p2765_p8, %p2759_p5 }
  0x17   :  { %2769 = shalt.err (!%p2766_p9)
}
  0x18   :  { %31 = dma.hbm_to_vmem [thread:$0]  %s3373_s0, 256, %s26_s12, [#allocation3], %s2862_s14, %s2862_s14, %s2863_s15  }
  0x19   :  { %s2864_s21 = smov [#allocation7]   ;;  %s2865_s23 = smov [#allocation8]  }
  0x1a   :  { %s49_s22 = sshll.u32 %s2864_s21, 4  ;;  %s67_s24 = sshll.u32 %s2865_s23, 4  ;;  %s50_s22 = int_to_ptr.vmem [resolvable:$true] %s49_s22  ;;  %s68_s24 = int_to_ptr.vmem [resolvable:$true] %s67_s24 }
  0x1b   :  { %s2778_s1 = scalar_lea.vmem %s50_s22, 512  ;;  %p2783_p11 = scmp.lt.s32.totalorder %s50_s22, %s50_s22 }
  0x1c   :  { %p2779_p10 = scmp.ne.s32.totalorder %s50_s22, %s2778_s1  ;;  %p2784_p12 = scmp.lt.s32.totalorder %s2778_s1, %s2778_s1 }
  0x1e   :  { %p2785_p13 = por %p2784_p12, %p2783_p11 }
  0x20   :  { %p2786_p0 = pnand %p2785_p13, %p2779_p10 }
  0x22   :  { %2789 = shalt.err (!%p2786_p0)
}
  0x23   :  { %55 = dma.hbm_to_vmem [thread:$0]  %s3375_s2, 512, %s50_s22, [#allocation6], %s2862_s14, %s2862_s14, %s2863_s15  }
  0x24   :  { %s2798_s0 = scalar_lea.vmem %s68_s24, 256  ;;  %p2803_p2 = scmp.lt.s32.totalorder %s68_s24, %s68_s24 }
  0x25   :  { %p2799_p1 = scmp.ne.s32.totalorder %s68_s24, %s2798_s0  ;;  %p2804_p3 = scmp.lt.s32.totalorder %s2798_s0, %s2798_s0 }
  0x27   :  { %p2805_p4 = por %p2804_p3, %p2803_p2 }
  0x29   :  { %p2806_p5 = pnand %p2805_p4, %p2799_p1 }
  0x2b   :  { %2809 = shalt.err (!%p2806_p5)
}
  0x2c   :  { %73 = dma.hbm_to_vmem [thread:$0]  %s3379_s6, 256, %s68_s24, [#allocation9], %s2862_s14, %s2862_s14, %s2863_s15  }
  0x2d   :  { %2850 = dma.done.wait [#allocation3], 256  }
  0x2e   :  { %2851 = vsyncadd [#allocation3], 4294967040 }
  0x2f   :  { %2852 = dma.done.wait [#allocation6], 768  }
  0x30   :  { %2853 = vsyncadd [#allocation6], 4294966528 }
  0x31   :  { %2854 = dma.done.wait [#allocation9], 256  }
  0x32   :  { %2855 = vsyncadd [#allocation9], 4294967040  ;;  %vm119_vm0 = vcmask 261120   ;;  %v97_v0 = vld [vmem:[%s3376_s3 + $0x18] sm:$0xff]  ;;  %v96_v1 = vld [vmem:[%s3376_s3 + $0x10] sm:$0xff]  ;;  %v115_v18 = vlaneseq  ;;  %vm385_vm1 = vcmask 64512  }
  0x33   :  { %2435 = vmatprep.subr.mxu1 %v97_v0  ;;  %v88_v2 = vld [vmem:[#allocation2] sm:$0xff]  ;;  %v95_v3 = vld [vmem:[%s3376_s3 + $0x8] sm:$0xff]  ;;  %v2240_v6 = vld [vmem:[%s3376_s3 + $0x38] sm:$0xff]  ;;  %s2866_s29 = smov 120   ;;  %vm497_vm2 = vcmask 130048   ;;  %s2867_s11 = smov 112  }
  0x34   :  { %2436 = vmatpush3.msra.mxu1 %v97_v0  ;;  %2443 = vmatprep.mubr.msk.f32.mxu1 %vm119_vm0, %v88_v2  ;;  %v94_v4 = vld [vmem:[%s3376_s3] sm:$0xff]  ;;  %v2958_v5 = vld [vmem:[#allocation2 + $0x8] sm:$0xff]  ;;  %v90_v7 = vld [vmem:[#allocation5] sm:$0xff]  ;;  %v2993_v19 = vshrl.u32 %v115_v18, 7  ;;  %s2868_s13 = smov 104  }
  0x35   :  { %2437 = vmatprep.subr.mxu1 %v96_v1  ;;  %v2239_v8 = vld [vmem:[%s3376_s3 + $0x30] sm:$0xff]  ;;  %v92_v9 = vsub.f32 %v90_v7, %v88_v2  ;;  %v91_v10 = vld [vmem:[#allocation5 + $0x8] sm:$0xff]  ;;  %v2238_v11 = vld [vmem:[%s3376_s3 + $0x28] sm:$0xff] }
  0x36   :  { %2438 = vmatpush3.msra.mxu1 %v96_v1  ;;  %v2237_v12 = vld [vmem:[%s3376_s3 + $0x20] sm:$0xff]  ;;  %v93_v13 = vsub.f32 %v91_v10, %v2958_v5  ;;  %v2244_v14 = vld [vmem:[%s3376_s3 + $0x58] sm:$0xff]  ;;  %v2243_v15 = vld [vmem:[%s3376_s3 + $0x50] sm:$0xff]  ;;  %v117_v20 = vsub.s32 0, %v2993_v19  ;;  %v219_v24 = vsub.s32 1, %v2993_v19  ;;  %v304_v37 = vsub.s32 2, %v2993_v19 }
  0x37   :  { %2439 = vmatprep.subr.mxu1 %v95_v3  ;;  %v2242_v16 = vld [vmem:[%s3376_s3 + $0x48] sm:$0xff]  ;;  %v2241_v17 = vld [vmem:[%s3376_s3 + $0x40] sm:$0xff]  ;;  %v3066_v60 = vld [vmem:[#allocation7 + $0x10] sm:$0xff] }
  0x38   :  { %2440 = vmatpush3.msra.mxu1 %v95_v3  ;;  %v2996_v21 = vld [vmem:[#allocation8] sm:$0xff]  ;;  %v3059_v50 = vld [vmem:[#allocation7 + $0x8] sm:$0xff]  ;;  %v3069_v0 = vld [vmem:[#allocation7 + $0x18] sm:$0xff] }
  0x39   :  { %2441 = vmatprep.subr.mxu1 %v94_v4  ;;  %v118_v23 = vrot.slane %v2996_v21, %v117_v20  ;;  %v220_v28 = vrot.slane %v2996_v21, %v219_v24  ;;  %v305_v38 = vrot.slane %v2996_v21, %v304_v37  ;;  %v3061_v53 = vld [vmem:[#allocation7] sm:$0xff] }
  0x3a   :  { %2442 = vmatpush3.msra.mxu1 %v94_v4 }
  0x3b   :  { %2444 = vmatmul.mubr.msk.f32.vlgmr.msra.gmra.mxu1 %vm119_vm0, %v2958_v5  ;;  %2449 = vmatprep.subr.mxu1 %v2240_v6 }
  0x3c   :  { %2450 = vmatpush3.msra.mxu1 %v2240_v6  ;;  %2446 = vmatprep.mubr.msk.f32.mxu1 %vm119_vm0, %v90_v7 }
  0x3d   :  { %2451 = vmatprep.subr.mxu1 %v2239_v8 }
  0x3e   :  { %2452 = vmatpush3.msra.mxu1 %v2239_v8 }
  0x3f   :  { %2447 = vmatmul.mubr.msk.f32.gmra.mxu1 %vm119_vm0, %v91_v10  ;;  %2453 = vmatprep.subr.mxu1 %v2238_v11 }
  0x40   :  { %2454 = vmatpush3.msra.mxu1 %v2238_v11  ;;  %2457 = vmatprep.mubr.msk.f32.mxu1 %vm119_vm0, %v92_v9 }
  0x41   :  { %2455 = vmatprep.subr.mxu1 %v2237_v12 }
  0x42   :  { %2456 = vmatpush3.msra.mxu1 %v2237_v12 }
  0x43   :  { %2458 = vmatmul.mubr.msk.f32.vlgmr.msra.gmra.mxu1 %vm119_vm0, %v93_v13  ;;  %2460 = vmatprep.subr.mxu1 %v2244_v14 }
  0x44   :  { %2461 = vmatpush3.msra.mxu1 %v2244_v14  ;;  %2468 = vmatprep.mubr.msk.f32.mxu1 %vm119_vm0, %v92_v9 }
  0x45   :  { %2462 = vmatprep.subr.mxu1 %v2243_v15 }
  0x46   :  { %2463 = vmatpush3.msra.mxu1 %v2243_v15 }
  0x47   :  { %2464 = vmatprep.subr.mxu1 %v2242_v16 }
  0x48   :  { %2465 = vmatpush3.msra.mxu1 %v2242_v16 }
  0x49   :  { %2466 = vmatprep.subr.mxu1 %v2241_v17 }
  0x4a   :  { %2467 = vmatpush3.msra.mxu1 %v2241_v17 }
  0x4b   :  { %2469 = vmatmul.mubr.msk.f32.vlgmr.msra.gmra.mxu1 %vm119_vm0, %v93_v13 }
  0xfb   :  { %v2445_v22 = vpop.f32.mrf.mxu1 }
  0xfc   :  { %v3007_v30 = vadd.f32 %v2445_v22, %v118_v23 }
  0xfd   :  { %v198_v25 = vpop.f32.mrf.mxu1 }
  0xfe   :  { %v3000_v26 = vadd.f32 %v198_v25, %v118_v23 }
  0xff   :  { %v2448_v27 = vpop.f32.mrf.mxu1 }
 0x100   :  { %639 = vrot.lane.b32.xlu1 %v3000_v26, %s2866_s29  ;;  %2475 = vmatprep.mubr.msk.f32.mxu1 %vm385_vm1, %v3000_v26  ;;  %v3013_v34 = vadd.f32 %v2448_v27, %v118_v23 }
 0x101   :  { %v208_v29 = vpop.f32.mrf.mxu1 }
 0x102   :  { %v3031_v36 = vadd.f32 %v208_v29, %v118_v23 }
 0x103   :  { %v2459_v31 = vpop.f32.mrf.mxu1 }
 0x104   :  { %v3009_v32 = vadd.f32 %v2459_v31, %v220_v28  ;;  %641 = vrot.lane.b32.xlu1 %v3007_v30, %s2866_s29 }
 0x105   :  { %v293_v33 = vpop.f32.mrf.mxu1 }
 0x106   :  { %v3015_v35 = vadd.f32 %v293_v33, %v220_v28  ;;  %649 = vrot.lane.b32.xlu0 %v3009_v32, %s2866_s29  ;;  %2471 = vmatprep.subr.msk.mxu1 %vm385_vm1, %v3009_v32 }
 0x107   :  { %2472 = vmatpush3.xpose.msk.msra.mxu1 %vm385_vm1, %v3009_v32 }
 0x108   :  { %645 = vrot.lane.b32.xlu1 %v3013_v34, %s2866_s29  ;;  %2473 = vmatprep.subr.msk.mxu1 %vm385_vm1, %v3015_v35 }
 0x10a   :  { %647 = vrot.lane.b32.xlu0 %v3015_v35, %s2866_s29 }
 0x10b   :  { %2474 = vmatpush3.xpose.msk.msra.mxu1 %vm385_vm1, %v3015_v35  ;;  %v2470_v39 = vpop.f32.mrf.mxu1 }
 0x10c   :  { %v3043_v40 = vadd.f32 %v2470_v39, %v305_v38 }
 0x10d   :  { %v372_v41 = vpop.f32.mrf.mxu1 }
 0x10e   :  { %643 = vrot.lane.b32.xlu0 %v3031_v36, %s2866_s29  ;;  %2476 = vmatmul.mubr.msk.f32.vlgmr.msra.gmra.mxu1 %vm385_vm1, %v3007_v30  ;;  %v3045_v42 = vadd.f32 %v372_v41, %v305_v38 }
 0x10f   :  { %2478 = vmatprep.mubr.msk.f32.mxu1 %vm385_vm1, %v3031_v36  ;;  %2481 = vmatprep.subr.mxu0 %v3043_v40 }
 0x110   :  { %2482 = vmatpush3.msra.mxu0 %v3043_v40 }
 0x111   :  { %2483 = vmatprep.subr.mxu0 %v3045_v42 }
 0x112   :  { %2479 = vmatmul.mubr.msk.f32.gmra.mxu1 %vm385_vm1, %v3013_v34  ;;  %2484 = vmatpush3.msra.mxu0 %v3045_v42 }
 0x172   :  { %v640_v43 = vpop.permute.xlu1 %639 }
 0x173   :  { %2495 = vmatprep.mubr.msk.f32.mxu1 %vm385_vm1, %v640_v43 }
 0x176   :  { %v642_v46 = vpop.permute.xlu1 %641 }
 0x178   :  { %v650_v44 = vpop.permute.xlu0 %649 }
 0x179   :  { %2491 = vmatprep.subr.msk.mxu1 %vm385_vm1, %v650_v44 }
 0x17a   :  { %2492 = vmatpush3.xpose.msk.msra.mxu1 %vm385_vm1, %v650_v44  ;;  %v646_v48 = vpop.permute.xlu1 %645 }
 0x17c   :  { %v648_v45 = vpop.permute.xlu0 %647 }
 0x17d   :  { %2493 = vmatprep.subr.msk.mxu1 %vm385_vm1, %v648_v45 }
 0x17e   :  { %2494 = vmatpush3.xpose.msk.msra.mxu1 %vm385_vm1, %v648_v45 }
 0x180   :  { %v644_v47 = vpop.permute.xlu0 %643 }
 0x181   :  { %2496 = vmatmul.mubr.msk.f32.vlgmr.msra.gmra.mxu1 %vm385_vm1, %v642_v46 }
 0x182   :  { %2498 = vmatprep.mubr.msk.f32.mxu1 %vm385_vm1, %v644_v47 }
 0x185   :  { %2499 = vmatmul.mubr.msk.f32.gmra.mxu1 %vm385_vm1, %v646_v48 }
 0x1ce   :  { %v2477_v49 = vpop.f32.mrf.mxu1 }
 0x1cf   :  { %v490_v51 = vmul.f32 0.35355338, %v2477_v49 }
 0x1d0   :  { %v470_v52 = vpop.f32.mrf.mxu1 }
 0x1d1   :  { %v489_v54 = vmul.f32 0.35355338, %v470_v52  ;;  %v494_v55 = vadd.f32 %v490_v51, %v3059_v50 }
 0x1d2   :  { %v2480_v56 = vpop.f32.mrf.mxu1 }
 0x1d3   :  { %v501_v57 = vsel %vm497_vm2, %v494_v55, -inf  ;;  %v493_v58 = vadd.f32 %v489_v54, %v3061_v53  ;;  %v492_v61 = vmul.f32 0.35355338, %v2480_v56 }
 0x1d4   :  { %502 = vmax.xlane.f32.xlu1 %v501_v57  ;;  %v480_v59 = vpop.f32.mrf.mxu1 }
 0x1d5   :  { %v491_v62 = vmul.f32 0.35355338, %v480_v59  ;;  %v498_v63 = vsel %vm497_vm2, %v493_v58, -inf  ;;  %v496_v3 = vadd.f32 %v492_v61, %v3069_v0 }
 0x1d6   :  { %499 = vmax.xlane.f32.xlu0 %v498_v63 }
 0x1d7   :  { %v495_v1 = vadd.f32 %v491_v62, %v3066_v60  ;;  %v507_v4 = vsel %vm497_vm2, %v496_v3, -inf }
 0x1d9   :  { %v504_v2 = vsel %vm497_vm2, %v495_v1, -inf }
 0x1da   :  { %505 = vmax.xlane.f32.xlu0 %v504_v2 }
 0x1de   :  { %508 = vmax.xlane.f32.xlu0 %v507_v4 }
 0x241   :  { %v2497_v6 = vpop.f32.mrf.mxu1 }
 0x242   :  { %v749_v7 = vmul.f32 0.35355338, %v2497_v6 }
 0x243   :  { %v729_v8 = vpop.f32.mrf.mxu1 }
 0x244   :  { %v748_v9 = vmul.f32 0.35355338, %v729_v8  ;;  %v753_v10 = vadd.f32 %v749_v7, %v3059_v50 }
 0x245   :  { %v2500_v11 = vpop.f32.mrf.mxu1 }
 0x246   :  { %v751_v12 = vmul.f32 0.35355338, %v2500_v11  ;;  %v759_v13 = vsel %vm497_vm2, %v753_v10, -inf  ;;  %v752_v14 = vadd.f32 %v748_v9, %v3061_v53 }
 0x247   :  { %v739_v15 = vpop.f32.mrf.mxu1  ;;  %760 = vmax.xlane.f32.xlu0 %v759_v13  ;;  %v2246_v13 = vld [vmem:[%s3376_s3 + $0x68] sm:$0xff] }
 0x248   :  { %v750_v16 = vmul.f32 0.35355338, %v739_v15  ;;  %v756_v17 = vsel %vm497_vm2, %v752_v14, -inf  ;;  %v755_v18 = vadd.f32 %v751_v12, %v3069_v0  ;;  %2511 = vmatprep.subr.mxu1 %v2246_v13 }
 0x249   :  { %757 = vmax.xlane.f32.xlu1 %v756_v17  ;;  %2512 = vmatpush3.msra.mxu1 %v2246_v13 }
 0x24a   :  { %v765_v20 = vsel %vm497_vm2, %v755_v18, -inf  ;;  %v754_v22 = vadd.f32 %v750_v16, %v3066_v60 }
 0x24b   :  { %766 = vmax.xlane.f32.xlu0 %v765_v20 }
 0x24c   :  { %v762_v23 = vsel %vm497_vm2, %v754_v22, -inf }
 0x24d   :  { %763 = vmax.xlane.f32.xlu1 %v762_v23 }
 0x25d   :  { %v503_v24 = vpop.xlane.xlu1 %502 }
 0x25e   :  { %v511_v25 = vsub.f32 %v494_v55, %v503_v24 }
 0x25f   :  { %v500_v27 = vpop.xlane.xlu0 %499 }
 0x260   :  { %v516_v28 = vmul.f32 1.442695, %v511_v25  ;;  %v510_v29 = vsub.f32 %v493_v58, %v500_v27 }
 0x262   :  { %2646 = vpow2.f32 %v516_v28  ;;  %v514_v31 = vmul.f32 1.442695, %v510_v29 }
 0x263   :  { %v506_v33 = vpop.xlane.xlu0 %505 }
 0x264   :  { %2648 = vpow2.f32 %v514_v31  ;;  %v512_v37 = vsub.f32 %v495_v1, %v506_v33 }
 0x266   :  { %v518_v38 = vmul.f32 1.442695, %v512_v37 }
 0x267   :  { %v509_v39 = vpop.xlane.xlu0 %508 }
 0x268   :  { %2650 = vpow2.f32 %v518_v38  ;;  %v513_v41 = vsub.f32 %v496_v3, %v509_v39 }
 0x26a   :  { %v520_v43 = vmul.f32 1.442695, %v513_v41  ;;  %v2245_v41 = vld [vmem:[%s3376_s3 + $0x60] sm:$0xff] }
 0x26c   :  { %2652 = vpow2.f32 %v520_v43 }
 0x26f   :  { %v3083_v44 = vpop.eup %2646 }
 0x270   :  { %v525_v45 = vsel %vm497_vm2, %v3083_v44, 0.0 }
 0x271   :  { %v2649_v46 = vpop.eup %2648  ;;  %526 = vadd.xlane.f32.xlu0 %v525_v45 }
 0x272   :  { %v522_v47 = vsel %vm497_vm2, %v2649_v46, 0.0 }
 0x273   :  { %523 = vadd.xlane.f32.xlu1 %v522_v47 }
 0x275   :  { %v2651_v48 = vpop.eup %2650 }
 0x276   :  { %v528_v49 = vsel %vm497_vm2, %v2651_v48, 0.0 }
 0x277   :  { %529 = vadd.xlane.f32.xlu1 %v528_v49 }
 0x279   :  { %v2653_v51 = vpop.eup %2652 }
 0x27a   :  { %v531_v52 = vsel %vm497_vm2, %v2653_v51, 0.0 }
 0x27b   :  { %532 = vadd.xlane.f32.xlu0 %v531_v52 }
 0x2d0   :  { %v761_v54 = vpop.xlane.xlu0 %760 }
 0x2d1   :  { %v769_v55 = vsub.f32 %v753_v10, %v761_v54 }
 0x2d2   :  { %v758_v56 = vpop.xlane.xlu1 %757 }
 0x2d3   :  { %v774_v57 = vmul.f32 1.442695, %v769_v55  ;;  %v768_v58 = vsub.f32 %v752_v14, %v758_v56 }
 0x2d4   :  { %v767_v59 = vpop.xlane.xlu0 %766 }
 0x2d5   :  { %2654 = vpow2.f32 %v774_v57  ;;  %v772_v61 = vmul.f32 1.442695, %v768_v58  ;;  %v771_v62 = vsub.f32 %v755_v18, %v767_v59 }
 0x2d6   :  { %v764_v63 = vpop.xlane.xlu1 %763 }
 0x2d7   :  { %2656 = vpow2.f32 %v772_v61  ;;  %v778_v1 = vmul.f32 1.442695, %v771_v62  ;;  %v770_v2 = vsub.f32 %v754_v22, %v764_v63 }
 0x2d9   :  { %2658 = vpow2.f32 %v778_v1  ;;  %v776_v3 = vmul.f32 1.442695, %v770_v2 }
 0x2db   :  { %2660 = vpow2.f32 %v776_v3 }
 0x2e2   :  { %v3090_v4 = vpop.eup %2654 }
 0x2e3   :  { %v783_v6 = vsel %vm497_vm2, %v3090_v4, 0.0 }
 0x2e4   :  { %v2657_v7 = vpop.eup %2656  ;;  %784 = vadd.xlane.f32.xlu0 %v783_v6 }
 0x2e5   :  { %v780_v8 = vsel %vm497_vm2, %v2657_v7, 0.0 }
 0x2e6   :  { %v3095_v9 = vpop.eup %2658  ;;  %781 = vadd.xlane.f32.xlu1 %v780_v8 }
 0x2e7   :  { %v789_v10 = vsel %vm497_vm2, %v3095_v9, 0.0 }
 0x2e8   :  { %v2661_v11 = vpop.eup %2660  ;;  %790 = vadd.xlane.f32.xlu0 %v789_v10 }
 0x2e9   :  { %v786_v12 = vsel %vm497_vm2, %v2661_v11, 0.0 }
 0x2ea   :  { %787 = vadd.xlane.f32.xlu1 %v786_v12 }
 0x2fa   :  { %v527_v14 = vpop.xlane.xlu0 %526 }
 0x2fb   :  { %804 = vrot.lane.b32.xlu1 %v3043_v40, %s2866_s29  ;;  %2662 = vrcp.f32 %v527_v14 }
 0x2fc   :  { %v524_v15 = vpop.xlane.xlu1 %523 }
 0x2fd   :  { %2664 = vrcp.f32 %v524_v15 }
 0x2fe   :  { %802 = vrot.lane.b32.xlu0 %v3045_v42, %s2866_s29 }
 0x2ff   :  { %1109 = vrot.lane.b32.xlu1 %v3009_v32, %s2867_s11 }
 0x300   :  { %v530_v16 = vpop.xlane.xlu1 %529 }
 0x301   :  { %2666 = vrcp.f32 %v530_v16 }
 0x302   :  { %1099 = vrot.lane.b32.xlu0 %v3000_v26, %s2867_s11 }
 0x303   :  { %1107 = vrot.lane.b32.xlu1 %v3015_v35, %s2867_s11 }
 0x304   :  { %v533_v17 = vpop.xlane.xlu0 %532 }
 0x305   :  { %2668 = vrcp.f32 %v533_v17 }
 0x306   :  { %1103 = vrot.lane.b32.xlu0 %v3031_v36, %s2867_s11 }
 0x307   :  { %1101 = vrot.lane.b32.xlu1 %v3007_v30, %s2867_s11 }
 0x308   :  { %v2663_v18 = vpop.eup %2662 }
 0x309   :  { %v539_v23 = vmul.f32 %v2663_v18, %v3083_v44 }
 0x30a   :  { %v2665_v20 = vpop.eup %2664 }
 0x30b   :  { %1105 = vrot.lane.b32.xlu1 %v3013_v34, %s2867_s11  ;;  %v538_v22 = vmul.f32 %v2665_v20, %v2649_v46 }
 0x30d   :  { %2485 = vmatprep.mubr.msk.f32.mxu0 %vm497_vm2, %v538_v22 }
 0x30e   :  { %v2667_v24 = vpop.eup %2666  ;;  %2486 = vmatmul.mubr.msk.f32.vlgmr.msra.gmra.mxu0 %vm497_vm2, %v539_v23 }
 0x30f   :  { %v540_v25 = vmul.f32 %v2667_v24, %v2651_v48 }
 0x311   :  { %2488 = vmatprep.mubr.msk.f32.mxu0 %vm497_vm2, %v540_v25 }
 0x312   :  { %v2669_v27 = vpop.eup %2668 }
 0x313   :  { %v541_v28 = vmul.f32 %v2669_v27, %v2653_v51 }
 0x315   :  { %2489 = vmatmul.mubr.msk.f32.gmra.mxu0 %vm497_vm2, %v541_v28 }
 0x36d   :  { %v785_v29 = vpop.xlane.xlu0 %784 }
 0x36e   :  { %2670 = vrcp.f32 %v785_v29 }
 0x36f   :  { %v782_v31 = vpop.xlane.xlu1 %781 }
 0x370   :  { %2672 = vrcp.f32 %v782_v31 }
 0x371   :  { %v791_v33 = vpop.xlane.xlu0 %790 }
 0x372   :  { %2674 = vrcp.f32 %v791_v33 }
 0x373   :  { %v788_v37 = vpop.xlane.xlu1 %787 }
 0x374   :  { %2676 = vrcp.f32 %v788_v37 }
 0x375   :  { %v803_v39 = vpop.permute.xlu0 %802 }
 0x377   :  { %v805_v38 = vpop.permute.xlu1 %804 }
 0x378   :  { %2501 = vmatprep.subr.mxu0 %v805_v38 }
 0x379   :  { %2502 = vmatpush3.msra.mxu0 %v805_v38  ;;  %v1100_v63 = vpop.permute.xlu0 %1099 }
 0x37a   :  { %2503 = vmatprep.subr.mxu0 %v803_v39 }
 0x37b   :  { %v1110_v43 = vpop.permute.xlu1 %1109  ;;  %2504 = vmatpush3.msra.mxu0 %v803_v39  ;;  %v2671_v44 = vpop.eup %2670 }
 0x37c   :  { %2527 = vmatprep.subr.msk.mxu1 %vm385_vm1, %v1110_v43  ;;  %2519 = vmatprep.subr.mxu0 %v2245_v41  ;;  %v797_v47 = vmul.f32 %v2671_v44, %v3090_v4 }
 0x37d   :  { %v2673_v45 = vpop.eup %2672  ;;  %v1104_v3 = vpop.permute.xlu0 %1103 }
 0x37e   :  { %v796_v46 = vmul.f32 %v2673_v45, %v2657_v7 }
 0x37f   :  { %v2675_v48 = vpop.eup %2674  ;;  %v1108_v61 = vpop.permute.xlu1 %1107 }
 0x380   :  { %2505 = vmatprep.mubr.msk.f32.mxu0 %vm497_vm2, %v796_v46  ;;  %v799_v52 = vmul.f32 %v2675_v48, %v3095_v9 }
 0x381   :  { %v2677_v49 = vpop.eup %2676  ;;  %2506 = vmatmul.mubr.msk.f32.vlgmr.msra.gmra.mxu0 %vm497_vm2, %v797_v47 }
 0x382   :  { %v798_v51 = vmul.f32 %v2677_v49, %v2661_v11  ;;  %2520 = vmatpush3.msra.mxu0 %v2245_v41 }
 0x383   :  { %v1102_v2 = vpop.permute.xlu1 %1101 }
 0x384   :  { %2508 = vmatprep.mubr.msk.f32.mxu0 %vm497_vm2, %v798_v51 }
 0x385   :  { %2509 = vmatmul.mubr.msk.f32.gmra.mxu0 %vm497_vm2, %v799_v52 }
 0x387   :  { %v1106_v4 = vpop.permute.xlu1 %1105 }
 0x3ce   :  { %v2487_v54 = vpop.f32.mrf.mxu0 }
 0x3d0   :  { %v620_v55 = vpop.f32.mrf.mxu0 }
 0x3d1   :  { %2521 = vmatprep.mubr.msk.f32.mxu0 %vm385_vm1, %v620_v55 }
 0x3d2   :  { %2522 = vmatmul.mubr.msk.f32.vlgmr.msra.gmra.mxu0 %vm385_vm1, %v2487_v54 }
 0x3d5   :  { %v2490_v56 = vpop.f32.mrf.mxu0 }
 0x3d7   :  { %v630_v57 = vpop.f32.mrf.mxu0 }
 0x3d8   :  { %2524 = vmatprep.mubr.msk.f32.mxu0 %vm385_vm1, %v630_v57 }
 0x3d9   :  { %2525 = vmatmul.mubr.msk.f32.gmra.mxu0 %vm385_vm1, %v2490_v56 }
 0x441   :  { %v2507_v58 = vpop.f32.mrf.mxu0 }
 0x443   :  { %v886_v59 = vpop.f32.mrf.mxu0 }
 0x444   :  { %2513 = vmatprep.mubr.msk.f32.mxu1 %vm385_vm1, %v886_v59 }
 0x445   :  { %v2510_v62 = vpop.f32.mrf.mxu0  ;;  %2514 = vmatmul.mubr.msk.f32.vlgmr.msra.gmra.mxu1 %vm385_vm1, %v2507_v58 }
 0x446   :  { %2528 = vmatpush3.xpose.msk.msra.mxu1 %vm385_vm1, %v1110_v43 }
 0x447   :  { %2529 = vmatprep.subr.msk.mxu1 %vm385_vm1, %v1108_v61  ;;  %v896_v1 = vpop.f32.mrf.mxu0 }
 0x448   :  { %2516 = vmatprep.mubr.msk.f32.mxu1 %vm385_vm1, %v896_v1 }
 0x449   :  { %2517 = vmatmul.mubr.msk.f32.gmra.mxu1 %vm385_vm1, %v2510_v62 }
 0x44a   :  { %2530 = vmatpush3.xpose.msk.msra.mxu1 %vm385_vm1, %v1108_v61  ;;  %2531 = vmatprep.mubr.msk.f32.mxu1 %vm385_vm1, %v1100_v63 }
 0x44d   :  { %2532 = vmatmul.mubr.msk.f32.vlgmr.msra.gmra.mxu1 %vm385_vm1, %v1102_v2 }
 0x44e   :  { %2534 = vmatprep.mubr.msk.f32.mxu1 %vm385_vm1, %v1104_v3 }
 0x451   :  { %2535 = vmatmul.mubr.msk.f32.gmra.mxu1 %vm385_vm1, %v1106_v4 }
 0x505   :  { %v3149_v6 = vpop.f32.mrf.mxu1 }
 0x507   :  { %v3151_v7 = vpop.f32.mrf.mxu1 }
 0x509   :  { %v3153_v8 = vpop.f32.mrf.mxu1 }
 0x50b   :  { %v3155_v9 = vpop.f32.mrf.mxu1 }
 0x50d   :  { %v2533_v10 = vpop.f32.mrf.mxu1 }
 0x50e   :  { %v1209_v11 = vmul.f32 0.35355338, %v2533_v10 }
 0x50f   :  { %v1189_v12 = vpop.f32.mrf.mxu1 }
 0x510   :  { %v1208_v13 = vmul.f32 0.35355338, %v1189_v12  ;;  %v1213_v14 = vadd.f32 %v1209_v11, %v3059_v50 }
 0x511   :  { %v2536_v15 = vpop.f32.mrf.mxu1 }
 0x512   :  { %v1219_v16 = vsel %vm497_vm2, %v1213_v14, -inf  ;;  %v1212_v17 = vadd.f32 %v1208_v13, %v3061_v53  ;;  %v1211_v20 = vmul.f32 0.35355338, %v2536_v15  ;;  %v2247_v15 = vld [vmem:[%s3376_s3 + $0x70] sm:$0xff] }
 0x513   :  { %1220 = vmax.xlane.f32.xlu1 %v1219_v16  ;;  %v1199_v18 = vpop.f32.mrf.mxu1  ;;  %2547 = vmatprep.subr.mxu1 %v2247_v15  ;;  %v2523_v16 = vpop.f32.mrf.mxu0 }
 0x514   :  { %v1210_v22 = vmul.f32 0.35355338, %v1199_v18  ;;  %v1216_v23 = vsel %vm497_vm2, %v1212_v17, -inf  ;;  %v1215_v27 = vadd.f32 %v1211_v20, %v3069_v0  ;;  %2548 = vmatpush3.msra.mxu1 %v2247_v15 }
 0x515   :  { %1217 = vmax.xlane.f32.xlu0 %v1216_v23 }
 0x516   :  { %v1214_v24 = vadd.f32 %v1210_v22, %v3066_v60  ;;  %v1225_v28 = vsel %vm497_vm2, %v1215_v27, -inf }
 0x518   :  { %v1222_v25 = vsel %vm497_vm2, %v1214_v24, -inf }
 0x519   :  { %1223 = vmax.xlane.f32.xlu0 %v1222_v25 }
 0x51d   :  { %1226 = vmax.xlane.f32.xlu0 %v1225_v28 }
 0x524   :  { %1262 = vrot.lane.b32.xlu1 %v3043_v40, %s2867_s11 }
 0x528   :  { %1474 = vrot.lane.b32.xlu1 %v3009_v32, %s2868_s13 }
 0x52c   :  { %1472 = vrot.lane.b32.xlu1 %v3015_v35, %s2868_s13 }
 0x533   :  { %1260 = vrot.lane.b32.xlu0 %v3045_v42, %s2867_s11 }
 0x59c   :  { %v1221_v29 = vpop.xlane.xlu1 %1220 }
 0x59d   :  { %v1229_v31 = vsub.f32 %v1213_v14, %v1221_v29 }
 0x59e   :  { %v1218_v33 = vpop.xlane.xlu0 %1217 }
 0x59f   :  { %v1234_v37 = vmul.f32 1.442695, %v1229_v31  ;;  %v1228_v38 = vsub.f32 %v1212_v17, %v1218_v33  ;;  %v1080_v17 = vpop.f32.mrf.mxu0 }
 0x5a0   :  { %v1263_v39 = vpop.permute.xlu1 %1262 }
 0x5a1   :  { %2678 = vpow2.f32 %v1234_v37  ;;  %v1232_v41 = vmul.f32 1.442695, %v1228_v38  ;;  %2537 = vmatprep.subr.mxu0 %v1263_v39  ;;  %v3200_v18 = vpop.f32.mrf.mxu0 }
 0x5a2   :  { %2538 = vmatpush3.msra.mxu0 %v1263_v39  ;;  %v1224_v43 = vpop.xlane.xlu0 %1223 }
 0x5a3   :  { %2680 = vpow2.f32 %v1232_v41  ;;  %v1230_v44 = vsub.f32 %v1214_v24, %v1224_v43  ;;  %v3202_v20 = vpop.f32.mrf.mxu0 }
 0x5a4   :  { %v1475_v48 = vpop.permute.xlu1 %1474 }
 0x5a5   :  { %v1236_v32 = vmul.f32 1.442695, %v1230_v44 }
 0x5a6   :  { %v1227_v45 = vpop.xlane.xlu0 %1226 }
 0x5a7   :  { %2682 = vpow2.f32 %v1236_v32  ;;  %v1231_v35 = vsub.f32 %v1215_v27, %v1227_v45 }
 0x5a8   :  { %v1473_v59 = vpop.permute.xlu1 %1472 }
 0x5a9   :  { %v1238_v46 = vmul.f32 1.442695, %v1231_v35 }
 0x5aa   :  { %v1261_v47 = vpop.permute.xlu0 %1260 }
 0x5ab   :  { %2684 = vpow2.f32 %v1238_v46  ;;  %2539 = vmatprep.subr.mxu0 %v1261_v47 }
 0x5ac   :  { %2540 = vmatpush3.msra.mxu0 %v1261_v47 }
 0x5ad   :  { %2555 = vmatprep.subr.msk.mxu0 %vm385_vm1, %v1475_v48 }
 0x5ae   :  { %v2679_v49 = vpop.eup %2678 }
 0x5af   :  { %v1243_v51 = vsel %vm497_vm2, %v2679_v49, 0.0 }
 0x5b0   :  { %v2681_v52 = vpop.eup %2680  ;;  %1244 = vadd.xlane.f32.xlu0 %v1243_v51 }
 0x5b1   :  { %v1240_v54 = vsel %vm497_vm2, %v2681_v52, 0.0 }
 0x5b2   :  { %1241 = vadd.xlane.f32.xlu1 %v1240_v54 }
 0x5b4   :  { %v2683_v55 = vpop.eup %2682 }
 0x5b5   :  { %v1246_v56 = vsel %vm497_vm2, %v2683_v55, 0.0 }
 0x5b6   :  { %1247 = vadd.xlane.f32.xlu1 %v1246_v56 }
 0x5b8   :  { %v2685_v57 = vpop.eup %2684 }
 0x5b9   :  { %v1249_v58 = vsel %vm497_vm2, %v2685_v57, 0.0 }
 0x5ba   :  { %1250 = vadd.xlane.f32.xlu0 %v1249_v58 }
 0x5c7   :  { %1466 = vrot.lane.b32.xlu1 %v3007_v30, %s2868_s13 }
 0x5cb   :  { %1470 = vrot.lane.b32.xlu1 %v3013_v34, %s2868_s13 }
 0x5d0   :  { %1464 = vrot.lane.b32.xlu0 %v3000_v26, %s2868_s13 }
 0x5d4   :  { %1468 = vrot.lane.b32.xlu0 %v3031_v36, %s2868_s13 }
 0x639   :  { %v1245_v61 = vpop.xlane.xlu0 %1244 }
 0x63a   :  { %2686 = vrcp.f32 %v1245_v61 }
 0x63b   :  { %v1242_v62 = vpop.xlane.xlu1 %1241 }
 0x63c   :  { %2688 = vrcp.f32 %v1242_v62 }
 0x63f   :  { %v1248_v63 = vpop.xlane.xlu1 %1247 }
 0x640   :  { %2690 = vrcp.f32 %v1248_v63 }
 0x643   :  { %v1251_v1 = vpop.xlane.xlu0 %1250  ;;  %v1467_v12 = vpop.permute.xlu1 %1466 }
 0x644   :  { %2692 = vrcp.f32 %v1251_v1 }
 0x647   :  { %v2687_v2 = vpop.eup %2686  ;;  %v1465_v10 = vpop.permute.xlu0 %1464 }
 0x648   :  { %v1257_v4 = vmul.f32 %v2687_v2, %v2679_v49  ;;  %v1471_v14 = vpop.permute.xlu1 %1470 }
 0x649   :  { %v2689_v30 = vpop.eup %2688 }
 0x64a   :  { %v1256_v3 = vmul.f32 %v2689_v30, %v2681_v52 }
 0x64b   :  { %v1469_v13 = vpop.permute.xlu0 %1468 }
 0x64c   :  { %2541 = vmatprep.mubr.msk.f32.mxu0 %vm497_vm2, %v1256_v3  ;;  %v1086_v3 = vadd.f32 %v2523_v16, %v3149_v6  ;;  %v2248_v6 = vld [vmem:[%s3376_s3 + $0x78] sm:$0xff] }
 0x64d   :  { %v2691_v34 = vpop.eup %2690  ;;  %2542 = vmatmul.mubr.msk.f32.vlgmr.msra.gmra.mxu0 %vm497_vm2, %v1257_v4 }
 0x64e   :  { %2556 = vmatpush3.xpose.msk.msra.mxu0 %vm385_vm1, %v1475_v48  ;;  %v1258_v26 = vmul.f32 %v2691_v34, %v2683_v55  ;;  %v1081_v34 = vadd.f32 %v1080_v17, %v3151_v7 }
 0x64f   :  { %2557 = vmatprep.subr.msk.mxu0 %vm385_vm1, %v1473_v59 }
 0x650   :  { %2544 = vmatprep.mubr.msk.f32.mxu0 %vm497_vm2, %v1258_v26 }
 0x651   :  { %v2693_v36 = vpop.eup %2692 }
 0x652   :  { %2558 = vmatpush3.xpose.msk.msra.mxu0 %vm385_vm1, %v1473_v59  ;;  %v1259_v11 = vmul.f32 %v2693_v36, %v2685_v57 }
 0x653   :  { %2575 = vmatprep.subr.mxu0 %v2248_v6 }
 0x654   :  { %2545 = vmatmul.mubr.msk.f32.gmra.mxu0 %vm497_vm2, %v1259_v11  ;;  %v1096_v11 = vadd.f32 %v3200_v18, %v3153_v8 }
 0x655   :  { %2559 = vmatprep.mubr.msk.f32.mxu0 %vm385_vm1, %v1465_v10 }
 0x658   :  { %2560 = vmatmul.mubr.msk.f32.vlgmr.msra.gmra.mxu0 %vm385_vm1, %v1467_v12 }
 0x659   :  { %2562 = vmatprep.mubr.msk.f32.mxu0 %vm385_vm1, %v1469_v13  ;;  %2576 = vmatpush3.msra.mxu0 %v2248_v6 }
 0x65c   :  { %2563 = vmatmul.mubr.msk.f32.gmra.mxu0 %vm385_vm1, %v1471_v14 }
 0x70d   :  { %v2543_v22 = vpop.f32.mrf.mxu0 }
 0x70f   :  { %v1344_v23 = vpop.f32.mrf.mxu0 }
 0x710   :  { %2549 = vmatprep.mubr.msk.f32.mxu1 %vm385_vm1, %v1344_v23 }
 0x711   :  { %2550 = vmatmul.mubr.msk.f32.vlgmr.msra.gmra.mxu1 %vm385_vm1, %v2543_v22 }
 0x714   :  { %v2546_v24 = vpop.f32.mrf.mxu0 }
 0x716   :  { %v1354_v25 = vpop.f32.mrf.mxu0 }
 0x717   :  { %2552 = vmatprep.mubr.msk.f32.mxu1 %vm385_vm1, %v1354_v25 }
 0x718   :  { %2553 = vmatmul.mubr.msk.f32.gmra.mxu1 %vm385_vm1, %v2546_v24  ;;  %v2561_v27 = vpop.f32.mrf.mxu0 }
 0x719   :  { %v1574_v28 = vmul.f32 0.35355338, %v2561_v27 }
 0x71a   :  { %v1554_v29 = vpop.f32.mrf.mxu0 }
 0x71b   :  { %v1573_v31 = vmul.f32 0.35355338, %v1554_v29  ;;  %v1578_v33 = vadd.f32 %v1574_v28, %v3059_v50 }
 0x71c   :  { %v2564_v37 = vpop.f32.mrf.mxu0 }
 0x71d   :  { %v1584_v38 = vsel %vm497_vm2, %v1578_v33, -inf  ;;  %v1577_v39 = vadd.f32 %v1573_v31, %v3061_v53  ;;  %v1576_v43 = vmul.f32 0.35355338, %v2564_v37 }
 0x71e   :  { %1585 = vmax.xlane.f32.xlu1 %v1584_v38  ;;  %v1564_v41 = vpop.f32.mrf.mxu0  ;;  %v1831_v38 = vsub.s32 3, %v2993_v19 }
 0x71f   :  { %v1575_v44 = vmul.f32 0.35355338, %v1564_v41  ;;  %v1581_v32 = vsel %vm497_vm2, %v1577_v39, -inf  ;;  %v1580_v46 = vadd.f32 %v1576_v43, %v3069_v0 }
 0x720   :  { %1582 = vmax.xlane.f32.xlu0 %v1581_v32 }
 0x721   :  { %v1579_v45 = vadd.f32 %v1575_v44, %v3066_v60  ;;  %v1590_v50 = vsel %vm497_vm2, %v1580_v46, -inf }
 0x723   :  { %v1587_v35 = vsel %vm497_vm2, %v1579_v45, -inf }
 0x724   :  { %1588 = vmax.xlane.f32.xlu0 %v1587_v35 }
 0x728   :  { %1591 = vmax.xlane.f32.xlu0 %v1590_v50  ;;  %v1091_v50 = vadd.f32 %v3202_v20, %v3155_v9  ;;  %v2728_v9 = vld [vmem:[#allocation5] sm:$0xff] }
 0x7a7   :  { %v1586_v47 = vpop.xlane.xlu1 %1585 }
 0x7a8   :  { %v1594_v48 = vsub.f32 %v1578_v33, %v1586_v47 }
 0x7a9   :  { %v1583_v53 = vpop.xlane.xlu0 %1582 }
 0x7aa   :  { %v1599_v49 = vmul.f32 1.442695, %v1594_v48  ;;  %v1593_v51 = vsub.f32 %v1577_v39, %v1583_v53  ;;  %v1832_v39 = vrot.slane %v2996_v21, %v1831_v38  ;;  %v2726_v53 = vld [vmem:[#allocation2] sm:$0xff] }
 0x7ac   :  { %2694 = vpow2.f32 %v1599_v49  ;;  %v1597_v52 = vmul.f32 1.442695, %v1593_v51 }
 0x7ad   :  { %v1589_v54 = vpop.xlane.xlu0 %1588 }
 0x7ae   :  { %2696 = vpow2.f32 %v1597_v52  ;;  %v1595_v55 = vsub.f32 %v1579_v45, %v1589_v54 }
 0x7b0   :  { %v1601_v56 = vmul.f32 1.442695, %v1595_v55 }
 0x7b1   :  { %v1592_v60 = vpop.xlane.xlu0 %1591 }
 0x7b2   :  { %2698 = vpow2.f32 %v1601_v56  ;;  %v1596_v57 = vsub.f32 %v1580_v46, %v1592_v60 }
 0x7b4   :  { %v1603_v58 = vmul.f32 1.442695, %v1596_v57  ;;  %v2727_v57 = vld [vmem:[#allocation5 + $0x8] sm:$0xff] }
 0x7b6   :  { %2700 = vpow2.f32 %v1603_v58 }
 0x7b9   :  { %v2695_v0 = vpop.eup %2694 }
 0x7ba   :  { %v1608_v59 = vsel %vm497_vm2, %v2695_v0, 0.0 }
 0x7bb   :  { %v2697_v61 = vpop.eup %2696  ;;  %1609 = vadd.xlane.f32.xlu0 %v1608_v59 }
 0x7bc   :  { %v1605_v62 = vsel %vm497_vm2, %v2697_v61, 0.0 }
 0x7bd   :  { %1606 = vadd.xlane.f32.xlu1 %v1605_v62 }
 0x7bf   :  { %v2699_v63 = vpop.eup %2698 }
 0x7c0   :  { %v1611_v1 = vsel %vm497_vm2, %v2699_v63, 0.0 }
 0x7c1   :  { %1612 = vadd.xlane.f32.xlu1 %v1611_v1 }
 0x7c3   :  { %v2701_v2 = vpop.eup %2700 }
 0x7c4   :  { %v1614_v30 = vsel %vm497_vm2, %v2701_v2, 0.0 }
 0x7c5   :  { %1615 = vadd.xlane.f32.xlu0 %v1614_v30 }
 0x7d1   :  { %v2551_v4 = vpop.f32.mrf.mxu1 }
 0x7d2   :  { %v1461_v26 = vadd.f32 %v2551_v4, %v1086_v3  ;;  %1627 = vrot.lane.b32.xlu1 %v3043_v40, %s2868_s13 }
 0x7d3   :  { %v1441_v36 = vpop.f32.mrf.mxu1 }
 0x7d4   :  { %v1460_v10 = vadd.f32 %v1441_v36, %v1081_v34 }
 0x7d8   :  { %v2554_v12 = vpop.f32.mrf.mxu1 }
 0x7d9   :  { %v1463_v13 = vadd.f32 %v2554_v12, %v1096_v11 }
 0x7da   :  { %v1451_v28 = vpop.f32.mrf.mxu1 }
 0x7db   :  { %1625 = vrot.lane.b32.xlu0 %v3045_v42, %s2868_s13  ;;  %v1462_v51 = vadd.f32 %v1451_v28, %v1091_v50  ;;  %v2029_v28 = vld [vmem:[%s3378_s5 + $0x40] sm:$0xff] }
 0x844   :  { %v1610_v7 = vpop.xlane.xlu0 %1609 }
 0x845   :  { %2702 = vrcp.f32 %v1610_v7 }
 0x846   :  { %v1607_v14 = vpop.xlane.xlu1 %1606 }
 0x847   :  { %2704 = vrcp.f32 %v1607_v14 }
 0x84a   :  { %v1613_v40 = vpop.xlane.xlu1 %1612 }
 0x84b   :  { %2706 = vrcp.f32 %v1613_v40 }
 0x84e   :  { %v1628_v15 = vpop.permute.xlu1 %1627  ;;  %v1616_v16 = vpop.xlane.xlu0 %1615 }
 0x84f   :  { %2708 = vrcp.f32 %v1616_v16  ;;  %2565 = vmatprep.subr.mxu1 %v1628_v15  ;;  %v1911_v16 = vld [vmem:[%s3377_s4 + $0x10] sm:$0xff] }
 0x850   :  { %2566 = vmatpush3.msra.mxu1 %v1628_v15  ;;  %v1912_v15 = vld [vmem:[%s3377_s4 + $0x18] sm:$0xff] }
 0x852   :  { %v1626_v8 = vpop.permute.xlu0 %1625  ;;  %v2703_v17 = vpop.eup %2702 }
 0x853   :  { %2567 = vmatprep.subr.mxu1 %v1626_v8  ;;  %v1622_v22 = vmul.f32 %v2703_v17, %v2695_v0  ;;  %v1909_v17 = vld [vmem:[%s3377_s4] sm:$0xff] }
 0x854   :  { %v2705_v42 = vpop.eup %2704  ;;  %2568 = vmatpush3.msra.mxu1 %v1626_v8  ;;  %v1910_v8 = vld [vmem:[%s3377_s4 + $0x8] sm:$0xff] }
 0x855   :  { %v1621_v18 = vmul.f32 %v2705_v42, %v2697_v61  ;;  %2583 = vmatprep.subr.mxu1 %v1912_v15  ;;  %v2036_v42 = vld [vmem:[%s3378_s5 + $0x78] sm:$0xff] }
 0x856   :  { %2597 = vmatprep.subr.mxu0 %v2036_v42 }
 0x857   :  { %2569 = vmatprep.mubr.msk.f32.mxu1 %vm497_vm2, %v1621_v18  ;;  %v2035_v18 = vld [vmem:[%s3378_s5 + $0x70] sm:$0xff] }
 0x858   :  { %v2707_v23 = vpop.eup %2706  ;;  %2570 = vmatmul.mubr.msk.f32.vlgmr.msra.gmra.mxu1 %vm497_vm2, %v1622_v22  ;;  %v2034_v22 = vld [vmem:[%s3378_s5 + $0x68] sm:$0xff] }
 0x859   :  { %v1623_v24 = vmul.f32 %v2707_v23, %v2699_v63  ;;  %2584 = vmatpush3.msra.mxu1 %v1912_v15  ;;  %v2033_v23 = vld [vmem:[%s3378_s5 + $0x60] sm:$0xff] }
 0x85a   :  { %2585 = vmatprep.subr.mxu1 %v1911_v16 }
 0x85b   :  { %2572 = vmatprep.mubr.msk.f32.mxu1 %vm497_vm2, %v1623_v24  ;;  %2586 = vmatpush3.msra.mxu1 %v1911_v16  ;;  %v2032_v24 = vld [vmem:[%s3378_s5 + $0x58] sm:$0xff] }
 0x85c   :  { %v2709_v25 = vpop.eup %2708  ;;  %2587 = vmatprep.subr.mxu1 %v1910_v8 }
 0x85d   :  { %v1624_v27 = vmul.f32 %v2709_v25, %v2701_v2  ;;  %2588 = vmatpush3.msra.mxu1 %v1910_v8  ;;  %v2031_v25 = vld [vmem:[%s3378_s5 + $0x50] sm:$0xff] }
 0x85e   :  { %2589 = vmatprep.subr.mxu1 %v1909_v17 }
 0x85f   :  { %2573 = vmatmul.mubr.msk.f32.gmra.mxu1 %vm497_vm2, %v1624_v27  ;;  %v2030_v27 = vld [vmem:[%s3378_s5 + $0x48] sm:$0xff] }
 0x860   :  { %2590 = vmatpush3.msra.mxu1 %v1909_v17  ;;  %v2039_v17 = vsub.s32 6, %v2993_v19 }
 0x918   :  { %v2571_v29 = vpop.f32.mrf.mxu1 }
 0x91a   :  { %v1709_v31 = vpop.f32.mrf.mxu1 }
 0x91b   :  { %2577 = vmatprep.mubr.msk.f32.mxu0 %vm385_vm1, %v1709_v31  ;;  %v2027_v31 = vld [vmem:[%s3378_s5 + $0x30] sm:$0xff] }
 0x91c   :  { %2578 = vmatmul.mubr.msk.f32.vlgmr.msra.gmra.mxu0 %vm385_vm1, %v2571_v29  ;;  %v2028_v29 = vld [vmem:[%s3378_s5 + $0x38] sm:$0xff] }
 0x91d   :  { %2598 = vmatpush3.msra.mxu0 %v2036_v42 }
 0x91e   :  { %2599 = vmatprep.subr.mxu0 %v2035_v18 }
 0x91f   :  { %v2574_v33 = vpop.f32.mrf.mxu1  ;;  %2600 = vmatpush3.msra.mxu0 %v2035_v18 }
 0x920   :  { %2601 = vmatprep.subr.mxu0 %v2034_v22 }
 0x921   :  { %v1719_v37 = vpop.f32.mrf.mxu1  ;;  %2602 = vmatpush3.msra.mxu0 %v2034_v22 }
 0x922   :  { %2580 = vmatprep.mubr.msk.f32.mxu0 %vm385_vm1, %v1719_v37  ;;  %2603 = vmatprep.subr.mxu0 %v2033_v23  ;;  %v2025_v37 = vld [vmem:[%s3378_s5 + $0x20] sm:$0xff] }
 0x923   :  { %2581 = vmatmul.mubr.msk.f32.gmra.mxu0 %vm385_vm1, %v2574_v33  ;;  %v2026_v33 = vld [vmem:[%s3378_s5 + $0x28] sm:$0xff] }
 0x924   :  { %2604 = vmatpush3.msra.mxu0 %v2033_v23 }
 0x925   :  { %2605 = vmatprep.subr.mxu0 %v2032_v24 }
 0x926   :  { %2606 = vmatpush3.msra.mxu0 %v2032_v24 }
 0x927   :  { %2607 = vmatprep.subr.mxu0 %v2031_v25 }
 0x928   :  { %2608 = vmatpush3.msra.mxu0 %v2031_v25 }
 0x929   :  { %2609 = vmatprep.subr.mxu0 %v2030_v27 }
 0x92a   :  { %2610 = vmatpush3.msra.mxu0 %v2030_v27 }
 0x92b   :  { %2611 = vmatprep.subr.mxu0 %v2029_v28 }
 0x92c   :  { %2612 = vmatpush3.msra.mxu0 %v2029_v28 }
 0x92d   :  { %2613 = vmatprep.subr.mxu0 %v2028_v29 }
 0x92e   :  { %2614 = vmatpush3.msra.mxu0 %v2028_v29 }
 0x92f   :  { %2615 = vmatprep.subr.mxu0 %v2027_v31 }
 0x930   :  { %2616 = vmatpush3.msra.mxu0 %v2027_v31 }
 0x931   :  { %2617 = vmatprep.subr.mxu0 %v2026_v33 }
 0x932   :  { %2618 = vmatpush3.msra.mxu0 %v2026_v33 }
 0x933   :  { %2619 = vmatprep.subr.mxu0 %v2025_v37 }
 0x934   :  { %2620 = vmatpush3.msra.mxu0 %v2025_v37 }
 0x9dc   :  { %v2579_v41 = vpop.f32.mrf.mxu0 }
 0x9dd   :  { %v1826_v43 = vadd.f32 %v2579_v41, %v1461_v26 }
 0x9de   :  { %v1806_v44 = vpop.f32.mrf.mxu0 }
 0x9df   :  { %v1834_v32 = vadd.f32 %v1832_v39, %v1826_v43  ;;  %v1825_v45 = vadd.f32 %v1806_v44, %v1460_v10 }
 0x9e1   :  { %v1833_v35 = vadd.f32 %v1832_v39, %v1825_v45  ;;  %v1838_v46 = vadd.f32 %v1834_v32, %v2958_v5 }
 0x9e3   :  { %v2582_v47 = vpop.f32.mrf.mxu0  ;;  %v1844_v48 = vsel %vm119_vm0, %v1838_v46, 0.0  ;;  %v1837_v49 = vadd.f32 %v2726_v53, %v1833_v35  ;;  %v1895_v53 = vsub.s32 4, %v2993_v19 }
 0x9e4   :  { %v1828_v52 = vadd.f32 %v2582_v47, %v1463_v13  ;;  %1845 = vadd.xlane.f32.xlu0 %v1844_v48 }
 0x9e5   :  { %v1816_v21 = vpop.f32.mrf.mxu0  ;;  %v1841_v54 = vsel %vm119_vm0, %v1837_v49, 0.0 }
 0x9e6   :  { %v1836_v55 = vadd.f32 %v1832_v39, %v1828_v52  ;;  %v1827_v56 = vadd.f32 %v1816_v21, %v1462_v51  ;;  %1842 = vadd.xlane.f32.xlu1 %v1841_v54  ;;  %v3317_v51 = vld [vmem:[#allocation8] sm:$0xff]  ;;  %v1903_v21 = vsub.s32 5, %v2993_v19 }
 0x9e7   :  { %v1896_v52 = vrot.slane %v3317_v51, %v1895_v53  ;;  %v2040_v42 = vrot.slane %v3317_v51, %v2039_v17 }
 0x9e8   :  { %v1835_v60 = vadd.f32 %v1832_v39, %v1827_v56  ;;  %v1840_v5 = vadd.f32 %v2727_v57, %v1836_v55  ;;  %v1904_v57 = vrot.slane %v3317_v51, %v1903_v21 }
 0x9ea   :  { %v1850_v58 = vsel %vm119_vm0, %v1840_v5, 0.0  ;;  %v1839_v20 = vadd.f32 %v2728_v9, %v1835_v60 }
 0x9eb   :  { %1851 = vadd.xlane.f32.xlu0 %v1850_v58 }
 0x9ec   :  { %v1847_v0 = vsel %vm119_vm0, %v1839_v20, 0.0 }
 0x9ed   :  { %1848 = vadd.xlane.f32.xlu1 %v1847_v0 }
 0xa6d   :  { %v1846_v59 = vpop.xlane.xlu0 %1845 }
 0xa6e   :  { %v1854_v61 = vmul.f32 0.03125, %v1846_v59 }
 0xa6f   :  { %v1843_v62 = vpop.xlane.xlu1 %1842 }
 0xa70   :  { %v3248_v63 = vsub.f32 %v1838_v46, %v1854_v61  ;;  %v1853_v1 = vmul.f32 0.03125, %v1843_v62 }
 0xa72   :  { %v3250_v2 = vsub.f32 %v1837_v49, %v1853_v1  ;;  %v1862_v30 = vmul.f32 %v3248_v63, %v3248_v63 }
 0xa74   :  { %v1852_v3 = vpop.xlane.xlu0 %1851  ;;  %v1868_v4 = vsel %vm119_vm0, %v1862_v30, 0.0  ;;  %v1861_v34 = vmul.f32 %v3250_v2, %v3250_v2  ;;  %v2024_v30 = vld [vmem:[%s3378_s5 + $0x18] sm:$0xff] }
 0xa75   :  { %v1856_v26 = vmul.f32 0.03125, %v1852_v3  ;;  %1869 = vadd.xlane.f32.xlu0 %v1868_v4  ;;  %2621 = vmatprep.subr.mxu0 %v2024_v30  ;;  %v2023_v3 = vld [vmem:[%s3378_s5 + $0x10] sm:$0xff]  ;;  %v2022_v4 = vld [vmem:[%s3378_s5 + $0x8] sm:$0xff] }
 0xa76   :  { %v1849_v36 = vpop.xlane.xlu1 %1848  ;;  %v1865_v10 = vsel %vm119_vm0, %v1861_v34, 0.0  ;;  %2622 = vmatpush3.msra.mxu0 %v2024_v30  ;;  %v2021_v34 = vld [vmem:[%s3378_s5] sm:$0xff]  ;;  %s2869_s5 = smov [#allocation10]  }
 0xa77   :  { %v3258_v11 = vsub.f32 %v1840_v5, %v1856_v26  ;;  %v1855_v12 = vmul.f32 0.03125, %v1849_v36  ;;  %1866 = vadd.xlane.f32.xlu1 %v1865_v10  ;;  %2623 = vmatprep.subr.mxu0 %v2023_v3  ;;  %v2313_v26 = vld [vmem:[%s3380_s7] ss:$0 sm:$0xff]  ;;  %s2207_s7 = sshll.u32 %s2869_s5, 4  ;;  %s2208_s7 = int_to_ptr.vmem [resolvable:$true] %s2207_s7 }
 0xa78   :  { %2624 = vmatpush3.msra.mxu0 %v2023_v3  ;;  %s2810_s11 = scalar_lea.vmem %s2208_s7, 256  ;;  %p2815_p7 = scmp.lt.s32.totalorder %s2208_s7, %s2208_s7 }
 0xa79   :  { %v3260_v13 = vsub.f32 %v1839_v20, %v1855_v12  ;;  %v1864_v6 = vmul.f32 %v3258_v11, %v3258_v11  ;;  %2625 = vmatprep.subr.mxu0 %v2022_v4  ;;  %p2811_p6 = scmp.ne.s32.totalorder %s2208_s7, %s2810_s11  ;;  %p2816_p8 = scmp.lt.s32.totalorder %s2810_s11, %s2810_s11 }
 0xa7a   :  { %2626 = vmatpush3.msra.mxu0 %v2022_v4 }
 0xa7b   :  { %v1874_v7 = vsel %vm119_vm0, %v1864_v6, 0.0  ;;  %v1863_v14 = vmul.f32 %v3260_v13, %v3260_v13  ;;  %2627 = vmatprep.subr.mxu0 %v2021_v34  ;;  %p2817_p9 = por %p2816_p8, %p2815_p7 }
 0xa7c   :  { %1875 = vadd.xlane.f32.xlu0 %v1874_v7  ;;  %2628 = vmatpush3.msra.mxu0 %v2021_v34 }
 0xa7d   :  { %v1871_v40 = vsel %vm119_vm0, %v1863_v14, 0.0  ;;  %p2818_p10 = pnand %p2817_p9, %p2811_p6 }
 0xa7e   :  { %1872 = vadd.xlane.f32.xlu1 %v1871_v40 }
 0xafe   :  { %v1870_v38 = vpop.xlane.xlu0 %1869 }
 0xaff   :  { %v1878_v39 = vmul.f32 0.03125, %v1870_v38 }
 0xb00   :  { %v1867_v41 = vpop.xlane.xlu1 %1866 }
 0xb01   :  { %v1882_v43 = vadd.f32 1e-05, %v1878_v39  ;;  %v1877_v44 = vmul.f32 0.03125, %v1867_v41 }
 0xb03   :  { %2710 = vrsqrt.f32 %v1882_v43  ;;  %v1881_v32 = vadd.f32 1e-05, %v1877_v44 }
 0xb05   :  { %2712 = vrsqrt.f32 %v1881_v32  ;;  %v1876_v45 = vpop.xlane.xlu0 %1875 }
 0xb06   :  { %v1880_v35 = vmul.f32 0.03125, %v1876_v45 }
 0xb07   :  { %v1873_v46 = vpop.xlane.xlu1 %1872 }
 0xb08   :  { %v1884_v50 = vadd.f32 1e-05, %v1880_v35  ;;  %v1879_v47 = vmul.f32 0.03125, %v1873_v46 }
 0xb0a   :  { %2714 = vrsqrt.f32 %v1884_v50  ;;  %v1883_v48 = vadd.f32 1e-05, %v1879_v47 }
 0xb0c   :  { %2716 = vrsqrt.f32 %v1883_v48 }
 0xb10   :  { %v2711_v49 = vpop.eup %2710 }
 0xb11   :  { %v1890_v54 = vmul.f32 %v2711_v49, %v3248_v63 }
 0xb12   :  { %v2713_v55 = vpop.eup %2712 }
 0xb13   :  { %v1889_v56 = vmul.f32 %v2713_v55, %v3250_v2  ;;  %v1898_v60 = vmul.f32 %v1896_v52, %v1890_v54 }
 0xb15   :  { %v1897_v5 = vmul.f32 %v1896_v52, %v1889_v56  ;;  %v1906_v20 = vadd.f32 %v1904_v57, %v1898_v60 }
 0xb17   :  { %v2715_v58 = vpop.eup %2714  ;;  %v1905_v9 = vadd.f32 %v1904_v57, %v1897_v5 }
 0xb18   :  { %v1892_v0 = vmul.f32 %v2715_v58, %v3258_v11 }
 0xb19   :  { %v2717_v59 = vpop.eup %2716  ;;  %2591 = vmatprep.mubr.msk.f32.mxu1 %vm119_vm0, %v1905_v9 }
 0xb1a   :  { %2592 = vmatmul.mubr.msk.f32.vlgmr.msra.gmra.mxu1 %vm119_vm0, %v1906_v20  ;;  %v1891_v61 = vmul.f32 %v2717_v59, %v3260_v13  ;;  %v1900_v62 = vmul.f32 %v1896_v52, %v1892_v0 }
 0xb1c   :  { %v1899_v63 = vmul.f32 %v1896_v52, %v1891_v61  ;;  %v1908_v2 = vadd.f32 %v1904_v57, %v1900_v62 }
 0xb1e   :  { %v1907_v1 = vadd.f32 %v1904_v57, %v1899_v63 }
 0xb20   :  { %2594 = vmatprep.mubr.msk.f32.mxu1 %vm119_vm0, %v1907_v1 }
 0xb21   :  { %2595 = vmatmul.mubr.msk.f32.gmra.mxu1 %vm119_vm0, %v1908_v2 }
 0xbda   :  { %v2593_v36 = vpop.f32.mrf.mxu1 }
 0xbdb   :  { %v2004_v10 = vadd.f32 %v2593_v36, %v2313_v26  ;;  %v2184_v36 = vsub.s32 7, %v2993_v19 }
 0xbdc   :  { %v1998_v11 = vpop.f32.mrf.mxu1 }
 0xbdd   :  { %v1999_v12 = vadd.f32 %v2313_v26, %v1998_v11  ;;  %v2018_v6 = vmax.f32 %v2004_v10, 0.0  ;;  %v2185_v10 = vrot.slane %v3317_v51, %v2184_v36 }
 0xbdf   :  { %v2017_v13 = vmax.f32 %v1999_v12, 0.0 }
 0xbe1   :  { %v2596_v7 = vpop.f32.mrf.mxu1  ;;  %2629 = vmatprep.mubr.f32.mxu0 %v2017_v13 }
 0xbe2   :  { %2630 = vmatmul.mubr.f32.vlgmr.msra.gmra.mxu0 %v2018_v6  ;;  %v2014_v14 = vadd.f32 %v2596_v7, %v2313_v26  ;;  %v2318_v6 = vld [vmem:[#allocation8 + $0x8] ss:$0 sm:$0xff] }
 0xbe3   :  { %v2008_v40 = vpop.f32.mrf.mxu1 }
 0xbe4   :  { %v2009_v15 = vadd.f32 %v2313_v26, %v2008_v40  ;;  %v2020_v8 = vmax.f32 %v2014_v14, 0.0 }
 0xbe6   :  { %v2019_v16 = vmax.f32 %v2009_v15, 0.0 }
 0xbe8   :  { %2632 = vmatprep.mubr.f32.mxu0 %v2019_v16 }
 0xbe9   :  { %2633 = vmatmul.mubr.f32.gmra.mxu0 %v2020_v8 }
 0xca2   :  { %v2631_v18 = vpop.f32.mrf.mxu0 }
 0xca3   :  { %v2113_v22 = vadd.f32 %v2631_v18, %v2040_v42 }
 0xca4   :  { %v2107_v23 = vpop.f32.mrf.mxu0 }
 0xca5   :  { %v2108_v24 = vadd.f32 %v2107_v23, %v2040_v42  ;;  %v2127_v25 = vadd.f32 %v2113_v22, %v1906_v20 }
 0xca7   :  { %v2133_v27 = vsel %vm119_vm0, %v2127_v25, 0.0  ;;  %v2126_v28 = vadd.f32 %v2108_v24, %v1905_v9 }
 0xca8   :  { %2134 = vadd.xlane.f32.xlu0 %v2133_v27 }
 0xca9   :  { %v2634_v29 = vpop.f32.mrf.mxu0  ;;  %v2130_v31 = vsel %vm119_vm0, %v2126_v28, 0.0 }
 0xcaa   :  { %v2123_v33 = vadd.f32 %v2634_v29, %v2040_v42  ;;  %2131 = vadd.xlane.f32.xlu1 %v2130_v31 }
 0xcab   :  { %v2117_v37 = vpop.f32.mrf.mxu0 }
 0xcac   :  { %v2118_v38 = vadd.f32 %v2117_v37, %v2040_v42  ;;  %v2129_v39 = vadd.f32 %v2123_v33, %v1908_v2 }
 0xcae   :  { %v2139_v41 = vsel %vm119_vm0, %v2129_v39, 0.0  ;;  %v2128_v43 = vadd.f32 %v2118_v38, %v1907_v1 }
 0xcaf   :  { %2140 = vadd.xlane.f32.xlu0 %v2139_v41 }
 0xcb0   :  { %v2136_v44 = vsel %vm119_vm0, %v2128_v43, 0.0 }
 0xcb1   :  { %2137 = vadd.xlane.f32.xlu1 %v2136_v44 }
 0xd31   :  { %v2135_v32 = vpop.xlane.xlu0 %2134 }
 0xd32   :  { %v2143_v45 = vmul.f32 0.03125, %v2135_v32 }
 0xd33   :  { %v2132_v35 = vpop.xlane.xlu1 %2131 }
 0xd34   :  { %v2147_v46 = vsub.f32 %v2127_v25, %v2143_v45  ;;  %v2142_v50 = vmul.f32 0.03125, %v2132_v35 }
 0xd36   :  { %v2146_v47 = vsub.f32 %v2126_v28, %v2142_v50  ;;  %v2151_v48 = vmul.f32 %v2147_v46, %v2147_v46 }
 0xd38   :  { %v2141_v53 = vpop.xlane.xlu0 %2140  ;;  %v2157_v49 = vsel %vm119_vm0, %v2151_v48, 0.0  ;;  %v2150_v52 = vmul.f32 %v2146_v47, %v2146_v47 }
 0xd39   :  { %v2145_v21 = vmul.f32 0.03125, %v2141_v53  ;;  %2158 = vadd.xlane.f32.xlu0 %v2157_v49 }
 0xd3a   :  { %v2138_v54 = vpop.xlane.xlu1 %2137  ;;  %v2154_v55 = vsel %vm119_vm0, %v2150_v52, 0.0 }
 0xd3b   :  { %v2149_v56 = vsub.f32 %v2129_v39, %v2145_v21  ;;  %v2144_v60 = vmul.f32 0.03125, %v2138_v54  ;;  %2155 = vadd.xlane.f32.xlu1 %v2154_v55 }
 0xd3d   :  { %v2148_v57 = vsub.f32 %v2128_v43, %v2144_v60  ;;  %v2153_v5 = vmul.f32 %v2149_v56, %v2149_v56 }
 0xd3f   :  { %v2163_v58 = vsel %vm119_vm0, %v2153_v5, 0.0  ;;  %v2152_v9 = vmul.f32 %v2148_v57, %v2148_v57 }
 0xd40   :  { %2164 = vadd.xlane.f32.xlu0 %v2163_v58 }
 0xd41   :  { %v2160_v20 = vsel %vm119_vm0, %v2152_v9, 0.0 }
 0xd42   :  { %2161 = vadd.xlane.f32.xlu1 %v2160_v20 }
 0xdc2   :  { %v2159_v0 = vpop.xlane.xlu0 %2158 }
 0xdc3   :  { %v2167_v59 = vmul.f32 0.03125, %v2159_v0 }
 0xdc4   :  { %v2156_v61 = vpop.xlane.xlu1 %2155 }
 0xdc5   :  { %v2171_v62 = vadd.f32 1e-05, %v2167_v59  ;;  %v2166_v63 = vmul.f32 0.03125, %v2156_v61 }
 0xdc7   :  { %2718 = vrsqrt.f32 %v2171_v62  ;;  %v2170_v1 = vadd.f32 1e-05, %v2166_v63 }
 0xdc9   :  { %2720 = vrsqrt.f32 %v2170_v1  ;;  %v2165_v2 = vpop.xlane.xlu0 %2164 }
 0xdca   :  { %v2169_v30 = vmul.f32 0.03125, %v2165_v2 }
 0xdcb   :  { %v2162_v3 = vpop.xlane.xlu1 %2161 }
 0xdcc   :  { %v2173_v4 = vadd.f32 1e-05, %v2169_v30  ;;  %v2168_v34 = vmul.f32 0.03125, %v2162_v3 }
 0xdce   :  { %2722 = vrsqrt.f32 %v2173_v4  ;;  %v2172_v26 = vadd.f32 1e-05, %v2168_v34 }
 0xdd0   :  { %2724 = vrsqrt.f32 %v2172_v26 }
 0xdd4   :  { %v2719_v11 = vpop.eup %2718 }
 0xdd5   :  { %v2179_v12 = vmul.f32 %v2719_v11, %v2147_v46 }
 0xdd6   :  { %v2721_v13 = vpop.eup %2720 }
 0xdd7   :  { %v2178_v7 = vmul.f32 %v2721_v13, %v2146_v47  ;;  %v2187_v14 = vmul.f32 %v2185_v10, %v2179_v12 }
 0xdd9   :  { %v2186_v40 = vmul.f32 %v2185_v10, %v2178_v7  ;;  %v2195_v15 = vadd.f32 %v2318_v6, %v2187_v14 }
 0xddb   :  { %v2723_v16 = vpop.eup %2722  ;;  %v2194_v8 = vadd.f32 %v2318_v6, %v2186_v40  ;;  %2199 = vst.msk [vmem:[#allocation10 + $0x8] sm:$0xff] %vm119_vm0, %v2195_v15 }
 0xddc   :  { %v2181_v17 = vmul.f32 %v2723_v16, %v2149_v56 }
 0xddd   :  { %v2725_v19 = vpop.eup %2724  ;;  %2198 = vst.msk [vmem:[#allocation10] sm:$0xff] %vm119_vm0, %v2194_v8 }
 0xdde   :  { %2821 = shalt.err (!%p2818_p10)
}
 0xddf   :  { %2213 = dma.vmem_to_hbm [thread:$0]  %s2208_s7, 256, %s3381_s8, [#allocation4], %s2862_s14, %s2862_s14, %s2863_s15   ;;  %v2180_v51 = vmul.f32 %v2725_v19, %v2148_v57  ;;  %v2189_v42 = vmul.f32 %v2185_v10, %v2181_v17 }
 0xde0   :  { %s2870_s13 = smov [#allocation11]  }
 0xde1   :  { %s2219_s16 = sshll.u32 %s2870_s13, 4  ;;  %v2188_v18 = vmul.f32 %v2185_v10, %v2180_v51  ;;  %v2197_v22 = vadd.f32 %v2318_v6, %v2189_v42  ;;  %s2220_s16 = int_to_ptr.vmem [resolvable:$true] %s2219_s16 }
 0xde2   :  { %s2830_s17 = scalar_lea.vmem %s2220_s16, 256  ;;  %p2835_p12 = scmp.lt.s32.totalorder %s2220_s16, %s2220_s16 }
 0xde3   :  { %v2196_v23 = vadd.f32 %v2318_v6, %v2188_v18  ;;  %2201 = vst.msk [vmem:[#allocation11 + $0x8] sm:$0xff] %vm119_vm0, %v2197_v22  ;;  %p2831_p11 = scmp.ne.s32.totalorder %s2220_s16, %s2830_s17  ;;  %p2836_p13 = scmp.lt.s32.totalorder %s2830_s17, %s2830_s17 }
 0xde5   :  { %2200 = vst.msk [vmem:[#allocation11] sm:$0xff] %vm119_vm0, %v2196_v23  ;;  %p2837_p0 = por %p2836_p13, %p2835_p12 }
 0xde7   :  { %p2838_p1 = pnand %p2837_p0, %p2831_p11 }
 0xde9   :  { %2841 = shalt.err (!%p2838_p1)
}
 0xdea   :  { %2225 = dma.vmem_to_hbm [thread:$0]  %s2220_s16, 256, %s3382_s9, [#allocation12], %s2862_s14, %s2862_s14, %s2863_s15  }
 0xdeb   :  { %2856 = dma.done.wait [#allocation4], 256  }
 0xdec   :  { %2857 = vsyncadd [#allocation4], 4294967040 }
 0xded   :  { %2858 = dma.done.wait [#allocation12], 256  }
 0xdee   :  { %2859 = vsyncadd [#allocation12], 4294967040 }
 0xdef   :  { %2232 = vsyncpa [#allocation3], 1 }
 0xdf0   :  { %2233 = vsyncpa [#allocation6], 1 }
 0xdf1   :  { %2234 = vsyncpa [#allocation9], 1 }
 0xdf2   :  { %2235 = vsyncpa [#allocation4], 1 }
 0xdf3   :  { %2236 = vsyncpa [#allocation12], 1 }

</bundles_post_ra>
